<compile_context>
chip_gen: v6e
topology: v6e:2x2x1
jax: 0.10.0
libtpu: 0.0.40
codegen_flags: <defaults>
</compile_context>

<pallas_src>
import functools

import jax
import jax.numpy as jnp
from jax.experimental import pallas as pl
from jax.experimental.pallas import tpu as pltpu


# --------------------------------------------------------------------------
# Kernels
# --------------------------------------------------------------------------
def _fm_kernel_reduce(x_ref, o_ref, *, num_fields, embed_dim):
    # x_ref: (tb, F*D) lane-dense tile, o_ref: (1, tb) lane-dense output row.
    D = embed_dim
    x0 = x_ref[:, 0:D].astype(jnp.float32)
    s = x0                              # running field sum          (tb, D)
    ss = x0 * x0                        # running sum of squares     (tb, D)
    for f in range(1, num_fields):      # F is small & static: unroll
        xf = x_ref[:, f * D:(f + 1) * D].astype(jnp.float32)
        s = s + xf
        ss = ss + xf * xf
    ix = s * s - ss                     # (tb, D)
    row = 0.5 * jnp.sum(ix, axis=1)     # (tb,)
    o_ref[...] = row.reshape(1, -1).astype(o_ref.dtype)


def _fm_kernel_noreduce(x_ref, o_ref, *, num_fields, embed_dim):
    # x_ref: (tb, F*D) lane-dense tile, o_ref: (tb, D).
    D = embed_dim
    x0 = x_ref[:, 0:D].astype(jnp.float32)
    s = x0
    ss = x0 * x0
    for f in range(1, num_fields):
        xf = x_ref[:, f * D:(f + 1) * D].astype(jnp.float32)
        s = s + xf
        ss = ss + xf * xf
    o_ref[...] = (0.5 * (s * s - ss)).astype(o_ref.dtype)


# --------------------------------------------------------------------------
# Tile selection
# --------------------------------------------------------------------------
def _choose_batch_tile(batch, row_bytes, batch_tile=None):
    """Pick a batch tile: multiple of 128 rows, ~4 MiB of input per tile."""
    if batch_tile is None:
        target_tile_bytes = 4 * 1024 * 1024           # ~4 MiB input per step
        tb = max(1, target_tile_bytes // max(row_bytes, 1))
        tb = min(tb, 4096)                            # cap f32 accumulator size
    else:
        tb = int(batch_tile)
    # never tile far beyond the (lane-rounded) batch
    tb = min(tb, max(((batch + 127) // 128) * 128, 128))
    # multiple of 128: satisfies (8,128) block rule + lane-dense (1, tb) output
    tb = max(128, (tb // 128) * 128)
    return tb


# --------------------------------------------------------------------------
# Wrapper
# --------------------------------------------------------------------------
@functools.partial(jax.jit, static_argnames=("reduce_sum", "batch_tile"))
def factorization_machine(x, *, reduce_sum: bool = True, batch_tile=None):
    """FM second-order interaction term.

    x: (B, F, D) float array.
    Returns (B, 1) if reduce_sum else (B, D).
    """
    B, F, D = x.shape
    itemsize = jnp.dtype(x.dtype).itemsize
    row_bytes = F * D * itemsize

    tb = _choose_batch_tile(B, row_bytes, batch_tile)
    B_pad = ((B + tb - 1) // tb) * tb
    grid = (B_pad // tb,)

    # Lane-dense input slab; zero-pad the batch (zero rows produce FM output 0).
    x2 = x.reshape(B, F * D)
    if B_pad != B:
        x2 = jnp.pad(x2, ((0, B_pad - B), (0, 0)))

    in_specs = [pl.BlockSpec((tb, F * D), lambda i: (i, 0))]

    out_elems = B * (1 if reduce_sum else D)
    cost = pl.CostEstimate(
        flops=3 * B * F * D + 4 * B * D,
        transcendentals=0,
        bytes_accessed=B * F * D * itemsize + out_elems * itemsize,
    )
    cparams = pltpu.CompilerParams(
        dimension_semantics=("parallel",),
        vmem_limit_bytes=48 * 1024 * 1024,   # safe on v5e/v6e (128 MiB) and v7x (64 MiB)
    )

    if reduce_sum:
        kernel = functools.partial(_fm_kernel_reduce, num_fields=F, embed_dim=D)
        out = pl.pallas_call(
            kernel,
            out_shape=jax.ShapeDtypeStruct((1, B_pad), x.dtype),
            grid_spec=pltpu.PrefetchScalarGridSpec(
                num_scalar_prefetch=0,
                grid=grid,
                in_specs=in_specs,
                out_specs=pl.BlockSpec((1, tb), lambda i: (0, i)),
            ),
            compiler_params=cparams,
            cost_estimate=cost,
        )(x2)
        return out[0, :B].reshape(B, 1)
    else:
        kernel = functools.partial(_fm_kernel_noreduce, num_fields=F, embed_dim=D)
        out = pl.pallas_call(
            kernel,
            out_shape=jax.ShapeDtypeStruct((B_pad, D), x.dtype),
            grid_spec=pltpu.PrefetchScalarGridSpec(
                num_scalar_prefetch=0,
                grid=grid,
                in_specs=in_specs,
                out_specs=pl.BlockSpec((tb, D), lambda i: (i, 0)),
            ),
            compiler_params=cparams,
            cost_estimate=cost,
        )(x2)
        return out[:B]


# --------------------------------------------------------------------------
# Pure-JAX reference (matches the PyTorch module)
# --------------------------------------------------------------------------
def _reference_fm(x, reduce_sum=True):
    square_of_sum = jnp.sum(x, axis=1) ** 2
    sum_of_square = jnp.sum(x ** 2, axis=1)
    ix = square_of_sum - sum_of_square
    if reduce_sum:
        ix = jnp.sum(ix, axis=1, keepdims=True)
    return 0.5 * ix


if __name__ == "__main__":
    key = jax.random.PRNGKey(0)
    B, F, D = 8, 8, 32          # batch, num_fields, embed_dim
    x = jax.random.normal(key, (B, F, D), dtype=jnp.float32)

    # reduce_sum=True path
    out = jax.block_until_ready(factorization_machine(x, reduce_sum=True))
    ref = _reference_fm(x, reduce_sum=True)
    assert out.shape == (B, 1), out.shape
    assert jnp.allclose(out, ref, atol=1e-3, rtol=1e-4), "mismatch vs reference (reduce)"

    # reduce_sum=False path
    out2 = jax.block_until_ready(factorization_machine(x, reduce_sum=False))
    ref2 = _reference_fm(x, reduce_sum=False)
    assert out2.shape == (B, D), out2.shape
    assert jnp.allclose(out2, ref2, atol=1e-3, rtol=1e-4), "mismatch vs reference (no reduce)"

    # ragged batch + multi-step grid (exercises zero-padding, pipelining, megacore)
    B2 = 300
    x_big = jax.random.normal(jax.random.PRNGKey(0), (B2, F, D), dtype=jnp.float32)
    out3 = jax.block_until_ready(
        factorization_machine(x_big, reduce_sum=True, batch_tile=128))
    ref3 = _reference_fm(x_big, reduce_sum=True)
    assert out3.shape == (B2, 1), out3.shape
    assert jnp.allclose(out3, ref3, atol=1e-3, rtol=1e-4), "mismatch vs reference (ragged)"

    print("KERNEL_OK")
</pallas_src>

<mosaic_0001>
module attributes {stable_mosaic.version = 11 : i64} {
  func.func @_fm_kernel_reduce(%arg0: i32, %arg1: memref<128x256xf32, #tpu.memory_space<vmem>>, %arg2: memref<1x128xf32, #tpu.memory_space<vmem>>) attributes {dimension_semantics = [#tpu.dimension_semantics<parallel>], iteration_bounds = array<i64: 1>, scalar_prefetch = 0 : i64, scratch_operands = 0 : i64, tpu.core_type = #tpu.core_type<tc>, window_params = [{transform_indices = @transform_0, window_bounds = array<i64: 128, 256>}, {transform_indices = @transform_1, window_bounds = array<i64: 1, 128>}]} {
    %c0 = arith.constant 0 : index
    %c0_0 = arith.constant 0 : index
    %0 = vector.load %arg1[%c0, %c0_0] : memref<128x256xf32, #tpu.memory_space<vmem>>, vector<128x32xf32>
    %1 = arith.mulf %0, %0 : vector<128x32xf32>
    %c0_1 = arith.constant 0 : index
    %c32 = arith.constant 32 : index
    %2 = vector.load %arg1[%c0_1, %c32] : memref<128x256xf32, #tpu.memory_space<vmem>>, vector<128x32xf32>
    %3 = arith.addf %0, %2 : vector<128x32xf32>
    %4 = arith.mulf %2, %2 : vector<128x32xf32>
    %5 = arith.addf %1, %4 : vector<128x32xf32>
    %c0_2 = arith.constant 0 : index
    %c64 = arith.constant 64 : index
    %6 = vector.load %arg1[%c0_2, %c64] : memref<128x256xf32, #tpu.memory_space<vmem>>, vector<128x32xf32>
    %7 = arith.addf %3, %6 : vector<128x32xf32>
    %8 = arith.mulf %6, %6 : vector<128x32xf32>
    %9 = arith.addf %5, %8 : vector<128x32xf32>
    %c0_3 = arith.constant 0 : index
    %c96 = arith.constant 96 : index
    %10 = vector.load %arg1[%c0_3, %c96] : memref<128x256xf32, #tpu.memory_space<vmem>>, vector<128x32xf32>
    %11 = arith.addf %7, %10 : vector<128x32xf32>
    %12 = arith.mulf %10, %10 : vector<128x32xf32>
    %13 = arith.addf %9, %12 : vector<128x32xf32>
    %c0_4 = arith.constant 0 : index
    %c128 = arith.constant 128 : index
    %14 = vector.load %arg1[%c0_4, %c128] : memref<128x256xf32, #tpu.memory_space<vmem>>, vector<128x32xf32>
    %15 = arith.addf %11, %14 : vector<128x32xf32>
    %16 = arith.mulf %14, %14 : vector<128x32xf32>
    %17 = arith.addf %13, %16 : vector<128x32xf32>
    %c0_5 = arith.constant 0 : index
    %c160 = arith.constant 160 : index
    %18 = vector.load %arg1[%c0_5, %c160] : memref<128x256xf32, #tpu.memory_space<vmem>>, vector<128x32xf32>
    %19 = arith.addf %15, %18 : vector<128x32xf32>
    %20 = arith.mulf %18, %18 : vector<128x32xf32>
    %21 = arith.addf %17, %20 : vector<128x32xf32>
    %c0_6 = arith.constant 0 : index
    %c192 = arith.constant 192 : index
    %22 = vector.load %arg1[%c0_6, %c192] : memref<128x256xf32, #tpu.memory_space<vmem>>, vector<128x32xf32>
    %23 = arith.addf %19, %22 : vector<128x32xf32>
    %24 = arith.mulf %22, %22 : vector<128x32xf32>
    %25 = arith.addf %21, %24 : vector<128x32xf32>
    %c0_7 = arith.constant 0 : index
    %c224 = arith.constant 224 : index
    %26 = vector.load %arg1[%c0_7, %c224] : memref<128x256xf32, #tpu.memory_space<vmem>>, vector<128x32xf32>
    %27 = arith.addf %23, %26 : vector<128x32xf32>
    %28 = arith.mulf %26, %26 : vector<128x32xf32>
    %29 = arith.addf %25, %28 : vector<128x32xf32>
    %30 = arith.mulf %27, %27 : vector<128x32xf32>
    %31 = arith.subf %30, %29 : vector<128x32xf32>
    %cst = arith.constant dense<0.000000e+00> : vector<128xf32>
    %32 = vector.multi_reduction <add>, %31, %cst [1] : vector<128x32xf32> to vector<128xf32>
    %cst_8 = arith.constant 5.000000e-01 : f32
    %33 = vector.broadcast %cst_8 : f32 to vector<128xf32>
    %34 = arith.mulf %33, %32 : vector<128xf32>
    %35 = vector.shape_cast %34 : vector<128xf32> to vector<1x128xf32>
    %c0_9 = arith.constant 0 : index
    %c0_10 = arith.constant 0 : index
    %36 = vector.load %arg2[%c0_9, %c0_10] : memref<1x128xf32, #tpu.memory_space<vmem>>, vector<1x128xf32>
    tpu.vector_store %arg2[%c0_9, %c0_10], %35 {strides = array<i32>} : memref<1x128xf32, #tpu.memory_space<vmem>>, vector<1x128xf32>,
    return
  }
  func.func @transform_0(%arg0: i32) -> (i32, i32) {
    %c0_i32 = arith.constant 0 : i32
    %c0_i32_0 = arith.constant 0 : i32
    return %arg0, %c0_i32 : i32, i32
  }
  func.func @transform_1(%arg0: i32) -> (i32, i32) {
    %c0_i32 = arith.constant 0 : i32
    %c0_i32_0 = arith.constant 0 : i32
    return %c0_i32, %arg0 : i32, i32
  }
}

</mosaic_0001>

<bundles_post_ra>
// kernel: factorization_machine.1
= control target key start
LH: loop header
LB: loop body
LE: loop exit
PB: predicated region body
PF: predicated region fallthrough
CT: control target
= control target key end

     0   :  { %s1177_s10 = smov 96   ;;  %s1178_s11 = smov 64   ;;  %vm968_vm0 = vcmask 261120   ;;  %vm1060_vm1 = vcmask 130112   ;;  %vm1067_vm2 = vcmask 195712   ;;  %vm1074_vm3 = vcmask 261312   ;;  %s2433_s0 = inlined_call_operand.vmem [shape: f32[128,256], index: 0, kind: input, shape index: {}]   ;;  %s2434_s1 = inlined_call_operand.vmem [shape: f32[1,128], index: 1, kind: output, shape index: {}]  }
   0x1   :  { %v1193_v0 = vld [vmem:[%s2433_s0 + $0x20] sm:$0xff]  ;;  %v1207_v2 = vld [vmem:[%s2433_s0 + $0x30] sm:$0xff]  ;;  %s1179_s12 = smov 32   ;;  %vm1081_vm4 = vcmask 326912   ;;  %vm1088_vm5 = vcmask 392512   ;;  %vm1095_vm6 = vcmask 458112  }
   0x2   :  { %v1198_v1 = vld [vmem:[%s2433_s0] sm:$0xff]  ;;  %60 = vrot.lane.b32.xlu1 %v1193_v0, %s1177_s10  ;;  %v1212_v3 = vld [vmem:[%s2433_s0 + $0x10] sm:$0xff]  ;;  %v1316_v18 = vmul.f32 %v1207_v2, %v1207_v2  ;;  %v1320_v19 = vmul.f32 %v1193_v0, %v1193_v0  ;;  %vm1102_vm7 = vcmask 523712   ;;  %vm1109_vm8 = vcmask 589312  }
   0x3   :  { %56 = vrot.lane.b32.xlu0 %v1198_v1, %s1177_s10  ;;  %v1221_v4 = vld [vmem:[%s2433_s0 + $0x50] sm:$0xff]  ;;  %v1226_v5 = vld [vmem:[%s2433_s0 + $0x40] sm:$0xff]  ;;  %v1304_v16 = vmul.f32 %v1212_v3, %v1212_v3  ;;  %v1308_v17 = vmul.f32 %v1198_v1, %v1198_v1  ;;  %vm1116_vm9 = vcmask 654912   ;;  %vm1123_vm10 = vcmask 720512  }
   0x4   :  { %2474 = vst [vmem:[#allocation2_spill] sm:$0xff] %v1221_v4  ;;  %2475 = vst [vmem:[#allocation3_spill] sm:$0xff] %v1226_v5  ;;  %v1235_v6 = vld [vmem:[%s2433_s0 + $0x70] sm:$0xff]  ;;  %v1240_v7 = vld [vmem:[%s2433_s0 + $0x60] sm:$0xff]  ;;  %v1328_v20 = vmul.f32 %v1221_v4, %v1221_v4  ;;  %v1332_v21 = vmul.f32 %v1226_v5, %v1226_v5  ;;  %vm1130_vm11 = vcmask 786112   ;;  %vm1137_vm12 = vcmask 851712  }
   0x5   :  { %2476 = vst [vmem:[#allocation4_spill] sm:$0xff] %v1235_v6  ;;  %2477 = vst [vmem:[#allocation5_spill] sm:$0xff] %v1240_v7  ;;  %v1249_v8 = vld [vmem:[%s2433_s0 + $0x90] sm:$0xff]  ;;  %v1254_v9 = vld [vmem:[%s2433_s0 + $0x80] sm:$0xff]  ;;  %v1340_v22 = vmul.f32 %v1235_v6, %v1235_v6  ;;  %v1344_v23 = vmul.f32 %v1240_v7, %v1240_v7  ;;  %vm1144_vm13 = vcmask 917312   ;;  %vm1151_vm14 = vcmask 982912  }
   0x6   :  { %62 = vrot.lane.b32.xlu1 %v1207_v2, %s1177_s10  ;;  %v1263_v10 = vld [vmem:[%s2433_s0 + $0xb0] sm:$0xff]  ;;  %v1268_v11 = vld [vmem:[%s2433_s0 + $0xa0] sm:$0xff]  ;;  %2478 = vst [vmem:[#allocation6_spill] sm:$0xff] %v1328_v20  ;;  %2479 = vst [vmem:[#allocation7_spill] sm:$0xff] %v1332_v21  ;;  %v1352_v24 = vmul.f32 %v1249_v8, %v1249_v8  ;;  %v1356_v25 = vmul.f32 %v1254_v9, %v1254_v9  ;;  %vm1158_vm15 = vcmask 1048512  }
   0x7   :  { %58 = vrot.lane.b32.xlu0 %v1212_v3, %s1177_s10  ;;  %v1277_v12 = vld [vmem:[%s2433_s0 + $0xd0] sm:$0xff]  ;;  %v1282_v13 = vld [vmem:[%s2433_s0 + $0xc0] sm:$0xff]  ;;  %2480 = vst [vmem:[#allocation8_spill] sm:$0xff] %v1340_v22  ;;  %2481 = vst [vmem:[#allocation9_spill] sm:$0xff] %v1344_v23  ;;  %v1364_v26 = vmul.f32 %v1263_v10, %v1263_v10  ;;  %v1368_v27 = vmul.f32 %v1268_v11, %v1268_v11 }
   0x8   :  { %v1291_v14 = vld [vmem:[%s2433_s0 + $0xf0] sm:$0xff]  ;;  %v1296_v15 = vld [vmem:[%s2433_s0 + $0xe0] sm:$0xff]  ;;  %2482 = vst [vmem:[#allocation10_spill] sm:$0xff] %v1352_v24  ;;  %2483 = vst [vmem:[#allocation11_spill] sm:$0xff] %v1356_v25  ;;  %v1376_v28 = vmul.f32 %v1277_v12, %v1277_v12  ;;  %v1380_v29 = vmul.f32 %v1282_v13, %v1282_v13 }
   0x9   :  { %2484 = vst [vmem:[#allocation12_spill] sm:$0xff] %v1364_v26  ;;  %2485 = vst [vmem:[#allocation13_spill] sm:$0xff] %v1368_v27  ;;  %v1388_v30 = vmul.f32 %v1291_v14, %v1291_v14  ;;  %v1392_v31 = vmul.f32 %v1296_v15, %v1296_v15 }
   0xa   :  { %66 = vrot.lane.b32.xlu1 %v1221_v4, %s1177_s10  ;;  %2486 = vst [vmem:[#allocation14_spill] sm:$0xff] %v1376_v28  ;;  %2487 = vst [vmem:[#allocation15_spill] sm:$0xff] %v1380_v29 }
   0xb   :  { %64 = vrot.lane.b32.xlu0 %v1226_v5, %s1177_s10  ;;  %2488 = vst [vmem:[#allocation16_spill] sm:$0xff] %v1388_v30  ;;  %2489 = vst [vmem:[#allocation17_spill] sm:$0xff] %v1392_v31 }
   0xe   :  { %70 = vrot.lane.b32.xlu1 %v1235_v6, %s1177_s10 }
   0xf   :  { %68 = vrot.lane.b32.xlu0 %v1240_v7, %s1177_s10 }
  0x12   :  { %74 = vrot.lane.b32.xlu1 %v1249_v8, %s1177_s10 }
  0x13   :  { %72 = vrot.lane.b32.xlu0 %v1254_v9, %s1177_s10 }
  0x16   :  { %78 = vrot.lane.b32.xlu1 %v1263_v10, %s1177_s10 }
  0x17   :  { %76 = vrot.lane.b32.xlu0 %v1268_v11, %s1177_s10 }
  0x1a   :  { %82 = vrot.lane.b32.xlu1 %v1277_v12, %s1177_s10 }
  0x1b   :  { %80 = vrot.lane.b32.xlu0 %v1282_v13, %s1177_s10 }
  0x1e   :  { %86 = vrot.lane.b32.xlu1 %v1291_v14, %s1177_s10 }
  0x1f   :  { %84 = vrot.lane.b32.xlu0 %v1296_v15, %s1177_s10 }
  0x22   :  { %138 = vrot.lane.b32.xlu1 %v1304_v16, %s1177_s10 }
  0x23   :  { %136 = vrot.lane.b32.xlu0 %v1308_v17, %s1177_s10 }
  0x26   :  { %142 = vrot.lane.b32.xlu1 %v1316_v18, %s1177_s10 }
  0x27   :  { %140 = vrot.lane.b32.xlu0 %v1320_v19, %s1177_s10 }
  0x2a   :  { %146 = vrot.lane.b32.xlu1 %v1328_v20, %s1177_s10 }
  0x2b   :  { %144 = vrot.lane.b32.xlu0 %v1332_v21, %s1177_s10 }
  0x2e   :  { %150 = vrot.lane.b32.xlu1 %v1340_v22, %s1177_s10 }
  0x2f   :  { %148 = vrot.lane.b32.xlu0 %v1344_v23, %s1177_s10 }
  0x32   :  { %154 = vrot.lane.b32.xlu1 %v1352_v24, %s1177_s10 }
  0x33   :  { %152 = vrot.lane.b32.xlu0 %v1356_v25, %s1177_s10 }
  0x36   :  { %158 = vrot.lane.b32.xlu1 %v1364_v26, %s1177_s10 }
  0x37   :  { %156 = vrot.lane.b32.xlu0 %v1368_v27, %s1177_s10 }
  0x3a   :  { %162 = vrot.lane.b32.xlu1 %v1376_v28, %s1177_s10 }
  0x3b   :  { %160 = vrot.lane.b32.xlu0 %v1380_v29, %s1177_s10 }
  0x3e   :  { %166 = vrot.lane.b32.xlu1 %v1388_v30, %s1177_s10 }
  0x3f   :  { %164 = vrot.lane.b32.xlu0 %v1392_v31, %s1177_s10 }
  0x42   :  { %202 = vrot.lane.b32.xlu1 %v1212_v3, %s1178_s11 }
  0x43   :  { %200 = vrot.lane.b32.xlu0 %v1198_v1, %s1178_s11 }
  0x46   :  { %206 = vrot.lane.b32.xlu1 %v1207_v2, %s1178_s11 }
  0x47   :  { %204 = vrot.lane.b32.xlu0 %v1193_v0, %s1178_s11 }
  0x4a   :  { %210 = vrot.lane.b32.xlu1 %v1221_v4, %s1178_s11 }
  0x4b   :  { %208 = vrot.lane.b32.xlu0 %v1226_v5, %s1178_s11 }
  0x4e   :  { %214 = vrot.lane.b32.xlu1 %v1235_v6, %s1178_s11 }
  0x4f   :  { %212 = vrot.lane.b32.xlu0 %v1240_v7, %s1178_s11 }
  0x52   :  { %218 = vrot.lane.b32.xlu1 %v1249_v8, %s1178_s11 }
  0x53   :  { %216 = vrot.lane.b32.xlu0 %v1254_v9, %s1178_s11 }
  0x56   :  { %222 = vrot.lane.b32.xlu1 %v1263_v10, %s1178_s11 }
  0x57   :  { %220 = vrot.lane.b32.xlu0 %v1268_v11, %s1178_s11 }
  0x5a   :  { %226 = vrot.lane.b32.xlu1 %v1277_v12, %s1178_s11 }
  0x5b   :  { %224 = vrot.lane.b32.xlu0 %v1282_v13, %s1178_s11 }
  0x5e   :  { %230 = vrot.lane.b32.xlu1 %v1291_v14, %s1178_s11 }
  0x5f   :  { %228 = vrot.lane.b32.xlu0 %v1296_v15, %s1178_s11 }
  0x62   :  { %266 = vrot.lane.b32.xlu1 %v1304_v16, %s1178_s11 }
  0x63   :  { %264 = vrot.lane.b32.xlu0 %v1308_v17, %s1178_s11 }
  0x66   :  { %270 = vrot.lane.b32.xlu1 %v1316_v18, %s1178_s11 }
  0x67   :  { %268 = vrot.lane.b32.xlu0 %v1320_v19, %s1178_s11 }
  0x6a   :  { %274 = vrot.lane.b32.xlu1 %v1328_v20, %s1178_s11 }
  0x6b   :  { %272 = vrot.lane.b32.xlu0 %v1332_v21, %s1178_s11 }
  0x6e   :  { %278 = vrot.lane.b32.xlu1 %v1340_v22, %s1178_s11 }
  0x6f   :  { %276 = vrot.lane.b32.xlu0 %v1344_v23, %s1178_s11 }
  0x72   :  { %282 = vrot.lane.b32.xlu1 %v1352_v24, %s1178_s11 }
  0x73   :  { %280 = vrot.lane.b32.xlu0 %v1356_v25, %s1178_s11 }
  0x74   :  { %v1450_v32 = vpop.permute.xlu1 %60 }
  0x75   :  { %v1452_v33 = vpop.permute.xlu0 %56 }
  0x76   :  { %286 = vrot.lane.b32.xlu1 %v1364_v26, %s1178_s11 }
  0x77   :  { %284 = vrot.lane.b32.xlu0 %v1368_v27, %s1178_s11 }
  0x78   :  { %v1458_v34 = vpop.permute.xlu1 %62 }
  0x79   :  { %v1460_v35 = vpop.permute.xlu0 %58 }
  0x7a   :  { %290 = vrot.lane.b32.xlu1 %v1376_v28, %s1178_s11 }
  0x7b   :  { %288 = vrot.lane.b32.xlu0 %v1380_v29, %s1178_s11 }
  0x7c   :  { %v1466_v36 = vpop.permute.xlu1 %66 }
  0x7d   :  { %2490 = vst [vmem:[#allocation18_spill] sm:$0xff] %v1466_v36  ;;  %v1468_v37 = vpop.permute.xlu0 %64 }
  0x7e   :  { %2491 = vst [vmem:[#allocation19_spill] sm:$0xff] %v1468_v37  ;;  %294 = vrot.lane.b32.xlu1 %v1388_v30, %s1178_s11 }
  0x7f   :  { %292 = vrot.lane.b32.xlu0 %v1392_v31, %s1178_s11 }
  0x80   :  { %v1474_v38 = vpop.permute.xlu1 %70 }
  0x81   :  { %2492 = vst [vmem:[#allocation20_spill] sm:$0xff] %v1474_v38  ;;  %v1476_v39 = vpop.permute.xlu0 %68 }
  0x82   :  { %2493 = vst [vmem:[#allocation21_spill] sm:$0xff] %v1476_v39  ;;  %330 = vrot.lane.b32.xlu1 %v1212_v3, %s1179_s12 }
  0x83   :  { %328 = vrot.lane.b32.xlu0 %v1198_v1, %s1179_s12 }
  0x84   :  { %v1482_v40 = vpop.permute.xlu1 %74 }
  0x85   :  { %2494 = vst [vmem:[#allocation22_spill] sm:$0xff] %v1482_v40  ;;  %v1484_v41 = vpop.permute.xlu0 %72  ;;  %v1736_v40 = vld [vmem:[%s2433_s0 + $0xe8] sm:$0xff] }
  0x86   :  { %2495 = vst [vmem:[#allocation23_spill] sm:$0xff] %v1484_v41  ;;  %334 = vrot.lane.b32.xlu1 %v1207_v2, %s1179_s12  ;;  %2539 = vst [vmem:[#allocation67_spill] sm:$0xff] %v1736_v40  ;;  %v1864_v36 = vmul.f32 %v1736_v40, %v1736_v40 }
  0x87   :  { %332 = vrot.lane.b32.xlu0 %v1193_v0, %s1179_s12 }
  0x88   :  { %v1490_v42 = vpop.permute.xlu1 %78  ;;  %2563 = vst [vmem:[#allocation91_spill] sm:$0xff] %v1864_v36 }
  0x89   :  { %2496 = vst [vmem:[#allocation24_spill] sm:$0xff] %v1490_v42  ;;  %v1492_v43 = vpop.permute.xlu0 %76  ;;  %v1682_v42 = vld [vmem:[%s2433_s0 + $0x88] sm:$0xff] }
  0x8a   :  { %2497 = vst [vmem:[#allocation25_spill] sm:$0xff] %v1492_v43  ;;  %338 = vrot.lane.b32.xlu1 %v1221_v4, %s1179_s12  ;;  %2530 = vst [vmem:[#allocation58_spill] sm:$0xff] %v1682_v42  ;;  %v1718_v43 = vld [vmem:[%s2433_s0 + $0xc8] sm:$0xff] }
  0x8b   :  { %336 = vrot.lane.b32.xlu0 %v1226_v5, %s1179_s12  ;;  %2536 = vst [vmem:[#allocation64_spill] sm:$0xff] %v1718_v43 }
  0x8c   :  { %v1498_v44 = vpop.permute.xlu1 %82 }
  0x8d   :  { %2498 = vst [vmem:[#allocation26_spill] sm:$0xff] %v1498_v44  ;;  %v1500_v45 = vpop.permute.xlu0 %80  ;;  %v1659_v44 = vld [vmem:[%s2433_s0 + $0x78] sm:$0xff] }
  0x8e   :  { %2499 = vst [vmem:[#allocation27_spill] sm:$0xff] %v1500_v45  ;;  %342 = vrot.lane.b32.xlu1 %v1235_v6, %s1179_s12  ;;  %2525 = vst [vmem:[#allocation53_spill] sm:$0xff] %v1659_v44  ;;  %v1664_v45 = vld [vmem:[%s2433_s0 + $0x68] sm:$0xff] }
  0x8f   :  { %340 = vrot.lane.b32.xlu0 %v1240_v7, %s1179_s12  ;;  %2526 = vst [vmem:[#allocation54_spill] sm:$0xff] %v1664_v45 }
  0x90   :  { %v1506_v46 = vpop.permute.xlu1 %86 }
  0x91   :  { %2500 = vst [vmem:[#allocation28_spill] sm:$0xff] %v1506_v46  ;;  %v1508_v47 = vpop.permute.xlu0 %84  ;;  %v1646_v46 = vld [vmem:[%s2433_s0 + $0x48] sm:$0xff] }
  0x92   :  { %2501 = vst [vmem:[#allocation29_spill] sm:$0xff] %v1508_v47  ;;  %346 = vrot.lane.b32.xlu1 %v1249_v8, %s1179_s12  ;;  %v1641_v47 = vld [vmem:[%s2433_s0 + $0x58] sm:$0xff]  ;;  %2522 = vst [vmem:[#allocation50_spill] sm:$0xff] %v1646_v46 }
  0x93   :  { %344 = vrot.lane.b32.xlu0 %v1254_v9, %s1179_s12  ;;  %2521 = vst [vmem:[#allocation49_spill] sm:$0xff] %v1641_v47 }
  0x94   :  { %v1514_v48 = vpop.permute.xlu1 %138 }
  0x95   :  { %v1516_v49 = vpop.permute.xlu0 %136 }
  0x96   :  { %350 = vrot.lane.b32.xlu1 %v1263_v10, %s1179_s12 }
  0x97   :  { %348 = vrot.lane.b32.xlu0 %v1268_v11, %s1179_s12 }
  0x98   :  { %v1522_v50 = vpop.permute.xlu1 %142 }
  0x99   :  { %2502 = vst [vmem:[#allocation30_spill] sm:$0xff] %v1522_v50  ;;  %v1524_v51 = vpop.permute.xlu0 %140 }
  0x9a   :  { %354 = vrot.lane.b32.xlu1 %v1277_v12, %s1179_s12 }
  0x9b   :  { %352 = vrot.lane.b32.xlu0 %v1282_v13, %s1179_s12 }
  0x9c   :  { %v1530_v52 = vpop.permute.xlu1 %146 }
  0x9d   :  { %2503 = vst [vmem:[#allocation31_spill] sm:$0xff] %v1530_v52  ;;  %v1532_v53 = vpop.permute.xlu0 %144 }
  0x9e   :  { %2504 = vst [vmem:[#allocation32_spill] sm:$0xff] %v1532_v53  ;;  %358 = vrot.lane.b32.xlu1 %v1291_v14, %s1179_s12  ;;  %v1605_v14 = vld [vmem:[%s2433_s0 + $0x18] sm:$0xff] }
  0x9f   :  { %356 = vrot.lane.b32.xlu0 %v1296_v15, %s1179_s12  ;;  %v1610_v15 = vld [vmem:[%s2433_s0 + $0x8] sm:$0xff] }
  0xa0   :  { %v1538_v54 = vpop.permute.xlu1 %150  ;;  %v1752_v41 = vmul.f32 %v1610_v15, %v1610_v15 }
  0xa1   :  { %2505 = vst [vmem:[#allocation33_spill] sm:$0xff] %v1538_v54  ;;  %v1540_v55 = vpop.permute.xlu0 %148 }
  0xa2   :  { %2506 = vst [vmem:[#allocation34_spill] sm:$0xff] %v1540_v55  ;;  %394 = vrot.lane.b32.xlu1 %v1304_v16, %s1179_s12 }
  0xa3   :  { %392 = vrot.lane.b32.xlu0 %v1308_v17, %s1179_s12 }
  0xa4   :  { %v1546_v56 = vpop.permute.xlu1 %154 }
  0xa5   :  { %2507 = vst [vmem:[#allocation35_spill] sm:$0xff] %v1546_v56  ;;  %v1548_v57 = vpop.permute.xlu0 %152 }
  0xa6   :  { %2508 = vst [vmem:[#allocation36_spill] sm:$0xff] %v1548_v57  ;;  %398 = vrot.lane.b32.xlu1 %v1316_v18, %s1179_s12 }
  0xa7   :  { %396 = vrot.lane.b32.xlu0 %v1320_v19, %s1179_s12 }
  0xa8   :  { %v1554_v58 = vpop.permute.xlu1 %158 }
  0xa9   :  { %2509 = vst [vmem:[#allocation37_spill] sm:$0xff] %v1554_v58  ;;  %v1556_v59 = vpop.permute.xlu0 %156 }
  0xaa   :  { %2510 = vst [vmem:[#allocation38_spill] sm:$0xff] %v1556_v59  ;;  %402 = vrot.lane.b32.xlu1 %v1328_v20, %s1179_s12 }
  0xab   :  { %400 = vrot.lane.b32.xlu0 %v1332_v21, %s1179_s12 }
  0xac   :  { %v1562_v60 = vpop.permute.xlu1 %162 }
  0xad   :  { %2511 = vst [vmem:[#allocation39_spill] sm:$0xff] %v1562_v60  ;;  %v1564_v61 = vpop.permute.xlu0 %160 }
  0xae   :  { %2512 = vst [vmem:[#allocation40_spill] sm:$0xff] %v1564_v61  ;;  %406 = vrot.lane.b32.xlu1 %v1340_v22, %s1179_s12 }
  0xaf   :  { %404 = vrot.lane.b32.xlu0 %v1344_v23, %s1179_s12 }
  0xb0   :  { %v1570_v62 = vpop.permute.xlu1 %166 }
  0xb1   :  { %2513 = vst [vmem:[#allocation41_spill] sm:$0xff] %v1570_v62  ;;  %v1572_v63 = vpop.permute.xlu0 %164 }
  0xb2   :  { %2514 = vst [vmem:[#allocation42_spill] sm:$0xff] %v1572_v63  ;;  %410 = vrot.lane.b32.xlu1 %v1352_v24, %s1179_s12 }
  0xb3   :  { %408 = vrot.lane.b32.xlu0 %v1356_v25, %s1179_s12 }
  0xb4   :  { %v1578_v8 = vpop.permute.xlu1 %202 }
  0xb5   :  { %v1580_v9 = vpop.permute.xlu0 %200 }
  0xb6   :  { %414 = vrot.lane.b32.xlu1 %v1364_v26, %s1179_s12 }
  0xb7   :  { %412 = vrot.lane.b32.xlu0 %v1368_v27, %s1179_s12  ;;  %v1700_v27 = vld [vmem:[%s2433_s0 + $0xa8] sm:$0xff] }
  0xb8   :  { %v1586_v10 = vpop.permute.xlu1 %206  ;;  %2534 = vst [vmem:[#allocation62_spill] sm:$0xff] %v1700_v27 }
  0xb9   :  { %v1588_v11 = vpop.permute.xlu0 %204 }
  0xba   :  { %418 = vrot.lane.b32.xlu1 %v1376_v28, %s1179_s12 }
  0xbb   :  { %416 = vrot.lane.b32.xlu0 %v1380_v29, %s1179_s12 }
  0xbc   :  { %v1594_v12 = vpop.permute.xlu1 %210 }
  0xbd   :  { %2515 = vst [vmem:[#allocation43_spill] sm:$0xff] %v1594_v12  ;;  %v1596_v13 = vpop.permute.xlu0 %208 }
  0xbe   :  { %2516 = vst [vmem:[#allocation44_spill] sm:$0xff] %v1596_v13  ;;  %422 = vrot.lane.b32.xlu1 %v1388_v30, %s1179_s12  ;;  %v1628_v30 = vld [vmem:[%s2433_s0 + $0x28] sm:$0xff] }
  0xbf   :  { %420 = vrot.lane.b32.xlu0 %v1392_v31, %s1179_s12  ;;  %v1623_v31 = vld [vmem:[%s2433_s0 + $0x38] sm:$0xff]  ;;  %v1768_v38 = vmul.f32 %v1628_v30, %v1628_v30 }
  0xc0   :  { %v1612_v63 = vpop.permute.xlu1 %214 }
  0xc1   :  { %2517 = vst [vmem:[#allocation45_spill] sm:$0xff] %v1612_v63  ;;  %v1614_v62 = vpop.permute.xlu0 %212  ;;  %v1764_v63 = vmul.f32 %v1623_v31, %v1623_v31 }
  0xc2   :  { %2518 = vst [vmem:[#allocation46_spill] sm:$0xff] %v1614_v62  ;;  %538 = vrot.lane.b32.xlu1 %v1605_v14, %s1177_s10 }
  0xc3   :  { %536 = vrot.lane.b32.xlu0 %v1610_v15, %s1177_s10 }
  0xc4   :  { %v1630_v60 = vpop.permute.xlu1 %218 }
  0xc5   :  { %2519 = vst [vmem:[#allocation47_spill] sm:$0xff] %v1630_v60  ;;  %v1632_v28 = vpop.permute.xlu0 %216  ;;  %v1731_v60 = vld [vmem:[%s2433_s0 + $0xf8] sm:$0xff] }
  0xc6   :  { %2520 = vst [vmem:[#allocation48_spill] sm:$0xff] %v1632_v28  ;;  %542 = vrot.lane.b32.xlu1 %v1623_v31, %s1177_s10  ;;  %2538 = vst [vmem:[#allocation66_spill] sm:$0xff] %v1731_v60  ;;  %v1748_v28 = vmul.f32 %v1605_v14, %v1605_v14  ;;  %v1860_v21 = vmul.f32 %v1731_v60, %v1731_v60 }
  0xc7   :  { %540 = vrot.lane.b32.xlu0 %v1628_v30, %s1177_s10 }
  0xc8   :  { %v1648_v61 = vpop.permute.xlu1 %222  ;;  %2562 = vst [vmem:[#allocation90_spill] sm:$0xff] %v1860_v21 }
  0xc9   :  { %2523 = vst [vmem:[#allocation51_spill] sm:$0xff] %v1648_v61  ;;  %v1650_v29 = vpop.permute.xlu0 %220  ;;  %v1677_v61 = vld [vmem:[%s2433_s0 + $0x98] sm:$0xff] }
  0xca   :  { %2524 = vst [vmem:[#allocation52_spill] sm:$0xff] %v1650_v29  ;;  %546 = vrot.lane.b32.xlu1 %v1641_v47, %s1177_s10  ;;  %2529 = vst [vmem:[#allocation57_spill] sm:$0xff] %v1677_v61 }
  0xcb   :  { %544 = vrot.lane.b32.xlu0 %v1646_v46, %s1177_s10 }
  0xcc   :  { %v1666_v58 = vpop.permute.xlu1 %226 }
  0xcd   :  { %2527 = vst [vmem:[#allocation55_spill] sm:$0xff] %v1666_v58  ;;  %v1668_v26 = vpop.permute.xlu0 %224 }
  0xce   :  { %2528 = vst [vmem:[#allocation56_spill] sm:$0xff] %v1668_v26  ;;  %550 = vrot.lane.b32.xlu1 %v1659_v44, %s1177_s10  ;;  %v1695_v26 = vld [vmem:[%s2433_s0 + $0xb8] sm:$0xff] }
  0xcf   :  { %548 = vrot.lane.b32.xlu0 %v1664_v45, %s1177_s10  ;;  %2533 = vst [vmem:[#allocation61_spill] sm:$0xff] %v1695_v26 }
  0xd0   :  { %v1684_v59 = vpop.permute.xlu1 %230 }
  0xd1   :  { %2531 = vst [vmem:[#allocation59_spill] sm:$0xff] %v1684_v59  ;;  %v1686_v58 = vpop.permute.xlu0 %228 }
  0xd2   :  { %2532 = vst [vmem:[#allocation60_spill] sm:$0xff] %v1686_v58  ;;  %554 = vrot.lane.b32.xlu1 %v1677_v61, %s1177_s10  ;;  %v1713_v58 = vld [vmem:[%s2433_s0 + $0xd8] sm:$0xff] }
  0xd3   :  { %552 = vrot.lane.b32.xlu0 %v1682_v42, %s1177_s10  ;;  %2535 = vst [vmem:[#allocation63_spill] sm:$0xff] %v1713_v58 }
  0xd4   :  { %v1702_v29 = vpop.permute.xlu1 %266 }
  0xd5   :  { %v1704_v59 = vpop.permute.xlu0 %264 }
  0xd6   :  { %558 = vrot.lane.b32.xlu1 %v1695_v26, %s1177_s10 }
  0xd7   :  { %556 = vrot.lane.b32.xlu0 %v1700_v27, %s1177_s10 }
  0xd8   :  { %v1720_v56 = vpop.permute.xlu1 %270 }
  0xd9   :  { %2537 = vst [vmem:[#allocation65_spill] sm:$0xff] %v1720_v56  ;;  %v1722_v24 = vpop.permute.xlu0 %268 }
  0xda   :  { %562 = vrot.lane.b32.xlu1 %v1713_v58, %s1177_s10 }
  0xdb   :  { %560 = vrot.lane.b32.xlu0 %v1718_v43, %s1177_s10 }
  0xdc   :  { %v1738_v57 = vpop.permute.xlu1 %274 }
  0xdd   :  { %2540 = vst [vmem:[#allocation68_spill] sm:$0xff] %v1738_v57  ;;  %v1740_v25 = vpop.permute.xlu0 %272 }
  0xde   :  { %2541 = vst [vmem:[#allocation69_spill] sm:$0xff] %v1740_v25  ;;  %566 = vrot.lane.b32.xlu1 %v1731_v60, %s1177_s10 }
  0xdf   :  { %564 = vrot.lane.b32.xlu0 %v1736_v40, %s1177_s10 }
  0xe0   :  { %v1754_v54 = vpop.permute.xlu1 %278 }
  0xe1   :  { %2542 = vst [vmem:[#allocation70_spill] sm:$0xff] %v1754_v54  ;;  %v1756_v22 = vpop.permute.xlu0 %276  ;;  %v1780_v54 = vmul.f32 %v1641_v47, %v1641_v47 }
  0xe2   :  { %2543 = vst [vmem:[#allocation71_spill] sm:$0xff] %v1756_v22  ;;  %618 = vrot.lane.b32.xlu1 %v1748_v28, %s1177_s10  ;;  %v1784_v22 = vmul.f32 %v1646_v46, %v1646_v46 }
  0xe3   :  { %616 = vrot.lane.b32.xlu0 %v1752_v41, %s1177_s10 }
  0xe4   :  { %v1770_v6 = vpop.permute.xlu1 %282  ;;  %2546 = vst [vmem:[#allocation74_spill] sm:$0xff] %v1784_v22 }
  0xe5   :  { %2544 = vst [vmem:[#allocation72_spill] sm:$0xff] %v1770_v6  ;;  %v1772_v55 = vpop.permute.xlu0 %280  ;;  %v1796_v6 = vmul.f32 %v1659_v44, %v1659_v44 }
  0xe6   :  { %2545 = vst [vmem:[#allocation73_spill] sm:$0xff] %v1772_v55  ;;  %622 = vrot.lane.b32.xlu1 %v1764_v63, %s1177_s10  ;;  %v1800_v55 = vmul.f32 %v1664_v45, %v1664_v45 }
  0xe7   :  { %620 = vrot.lane.b32.xlu0 %v1768_v38, %s1177_s10  ;;  %2549 = vst [vmem:[#allocation77_spill] sm:$0xff] %v1796_v6 }
  0xe8   :  { %v1786_v23 = vpop.permute.xlu1 %286  ;;  %2550 = vst [vmem:[#allocation78_spill] sm:$0xff] %v1800_v55 }
  0xe9   :  { %2547 = vst [vmem:[#allocation75_spill] sm:$0xff] %v1786_v23  ;;  %v1788_v62 = vpop.permute.xlu0 %284  ;;  %v1812_v23 = vmul.f32 %v1677_v61, %v1677_v61 }
  0xea   :  { %2548 = vst [vmem:[#allocation76_spill] sm:$0xff] %v1788_v62  ;;  %626 = vrot.lane.b32.xlu1 %v1780_v54, %s1177_s10  ;;  %v1816_v62 = vmul.f32 %v1682_v42, %v1682_v42 }
  0xeb   :  { %624 = vrot.lane.b32.xlu0 %v1784_v22, %s1177_s10  ;;  %2553 = vst [vmem:[#allocation81_spill] sm:$0xff] %v1812_v23 }
  0xec   :  { %v1802_v39 = vpop.permute.xlu1 %290  ;;  %2554 = vst [vmem:[#allocation82_spill] sm:$0xff] %v1816_v62 }
  0xed   :  { %2551 = vst [vmem:[#allocation79_spill] sm:$0xff] %v1802_v39  ;;  %v1804_v7 = vpop.permute.xlu0 %288  ;;  %v1828_v39 = vmul.f32 %v1695_v26, %v1695_v26 }
  0xee   :  { %2552 = vst [vmem:[#allocation80_spill] sm:$0xff] %v1804_v7  ;;  %630 = vrot.lane.b32.xlu1 %v1796_v6, %s1177_s10  ;;  %v1832_v7 = vmul.f32 %v1700_v27, %v1700_v27 }
  0xef   :  { %628 = vrot.lane.b32.xlu0 %v1800_v55, %s1177_s10  ;;  %2557 = vst [vmem:[#allocation85_spill] sm:$0xff] %v1828_v39 }
  0xf0   :  { %v1818_v57 = vpop.permute.xlu1 %294  ;;  %2558 = vst [vmem:[#allocation86_spill] sm:$0xff] %v1832_v7 }
  0xf1   :  { %2555 = vst [vmem:[#allocation83_spill] sm:$0xff] %v1818_v57  ;;  %v1820_v52 = vpop.permute.xlu0 %292  ;;  %v1848_v57 = vmul.f32 %v1718_v43, %v1718_v43 }
  0xf2   :  { %2556 = vst [vmem:[#allocation84_spill] sm:$0xff] %v1820_v52  ;;  %634 = vrot.lane.b32.xlu1 %v1812_v23, %s1177_s10  ;;  %v1844_v52 = vmul.f32 %v1713_v58, %v1713_v58 }
  0xf3   :  { %632 = vrot.lane.b32.xlu0 %v1816_v62, %s1177_s10  ;;  %2560 = vst [vmem:[#allocation88_spill] sm:$0xff] %v1848_v57 }
  0xf4   :  { %v1834_v20 = vpop.permute.xlu1 %330  ;;  %2559 = vst [vmem:[#allocation87_spill] sm:$0xff] %v1844_v52 }
  0xf5   :  { %v1836_v25 = vpop.permute.xlu0 %328 }
  0xf6   :  { %638 = vrot.lane.b32.xlu1 %v1828_v39, %s1177_s10 }
  0xf7   :  { %636 = vrot.lane.b32.xlu0 %v1832_v7, %s1177_s10 }
  0xf8   :  { %v1850_v12 = vpop.permute.xlu1 %334 }
  0xf9   :  { %2561 = vst [vmem:[#allocation89_spill] sm:$0xff] %v1850_v12  ;;  %v1852_v53 = vpop.permute.xlu0 %332 }
  0xfa   :  { %642 = vrot.lane.b32.xlu1 %v1844_v52, %s1177_s10 }
  0xfb   :  { %640 = vrot.lane.b32.xlu0 %v1848_v57, %s1177_s10 }
  0xfc   :  { %v1866_v4 = vpop.permute.xlu1 %338 }
  0xfd   :  { %2564 = vst [vmem:[#allocation92_spill] sm:$0xff] %v1866_v4  ;;  %v1868_v13 = vpop.permute.xlu0 %336 }
  0xfe   :  { %2565 = vst [vmem:[#allocation93_spill] sm:$0xff] %v1868_v13  ;;  %646 = vrot.lane.b32.xlu1 %v1860_v21, %s1177_s10 }
  0xff   :  { %644 = vrot.lane.b32.xlu0 %v1864_v36, %s1177_s10 }
 0x100   :  { %v1874_v37 = vpop.permute.xlu1 %342 }
 0x101   :  { %2566 = vst [vmem:[#allocation94_spill] sm:$0xff] %v1874_v37  ;;  %v1876_v5 = vpop.permute.xlu0 %340 }
 0x102   :  { %2567 = vst [vmem:[#allocation95_spill] sm:$0xff] %v1876_v5  ;;  %682 = vrot.lane.b32.xlu1 %v1605_v14, %s1178_s11 }
 0x103   :  { %680 = vrot.lane.b32.xlu0 %v1610_v15, %s1178_s11 }
 0x104   :  { %v1882_v56 = vpop.permute.xlu1 %346 }
 0x105   :  { %2568 = vst [vmem:[#allocation96_spill] sm:$0xff] %v1882_v56  ;;  %v1884_v4 = vpop.permute.xlu0 %344 }
 0x106   :  { %2569 = vst [vmem:[#allocation97_spill] sm:$0xff] %v1884_v4  ;;  %686 = vrot.lane.b32.xlu1 %v1623_v31, %s1178_s11 }
 0x107   :  { %684 = vrot.lane.b32.xlu0 %v1628_v30, %s1178_s11 }
 0x108   :  { %v1890_v13 = vpop.permute.xlu1 %350 }
 0x109   :  { %2570 = vst [vmem:[#allocation98_spill] sm:$0xff] %v1890_v13  ;;  %v1892_v37 = vpop.permute.xlu0 %348 }
 0x10a   :  { %2571 = vst [vmem:[#allocation99_spill] sm:$0xff] %v1892_v37  ;;  %690 = vrot.lane.b32.xlu1 %v1641_v47, %s1178_s11 }
 0x10b   :  { %688 = vrot.lane.b32.xlu0 %v1646_v46, %s1178_s11 }
 0x10c   :  { %v1898_v5 = vpop.permute.xlu1 %354 }
 0x10d   :  { %2572 = vst [vmem:[#allocation100_spill] sm:$0xff] %v1898_v5  ;;  %v1900_v56 = vpop.permute.xlu0 %352 }
 0x10e   :  { %2573 = vst [vmem:[#allocation101_spill] sm:$0xff] %v1900_v56  ;;  %694 = vrot.lane.b32.xlu1 %v1659_v44, %s1178_s11 }
 0x10f   :  { %692 = vrot.lane.b32.xlu0 %v1664_v45, %s1178_s11 }
 0x110   :  { %v1906_v4 = vpop.permute.xlu1 %358 }
 0x111   :  { %2574 = vst [vmem:[#allocation102_spill] sm:$0xff] %v1906_v4  ;;  %v1908_v13 = vpop.permute.xlu0 %356 }
 0x112   :  { %2575 = vst [vmem:[#allocation103_spill] sm:$0xff] %v1908_v13  ;;  %698 = vrot.lane.b32.xlu1 %v1677_v61, %s1178_s11 }
 0x113   :  { %696 = vrot.lane.b32.xlu0 %v1682_v42, %s1178_s11 }
 0x114   :  { %v1914_v37 = vpop.permute.xlu1 %394 }
 0x115   :  { %v1916_v5 = vpop.permute.xlu0 %392 }
 0x116   :  { %746 = vrot.lane.b32.xlu1 %v1748_v28, %s1178_s11 }
 0x117   :  { %744 = vrot.lane.b32.xlu0 %v1752_v41, %s1178_s11 }
 0x118   :  { %v1922_v56 = vpop.permute.xlu1 %398 }
 0x119   :  { %2576 = vst [vmem:[#allocation104_spill] sm:$0xff] %v1922_v56  ;;  %v1924_v4 = vpop.permute.xlu0 %396 }
 0x11a   :  { %2577 = vst [vmem:[#allocation105_spill] sm:$0xff] %v1924_v4  ;;  %810 = vrot.lane.b32.xlu1 %v1605_v14, %s1179_s12 }
 0x11b   :  { %808 = vrot.lane.b32.xlu0 %v1610_v15, %s1179_s12 }
 0x11c   :  { %v1930_v13 = vpop.permute.xlu1 %402 }
 0x11d   :  { %2578 = vst [vmem:[#allocation106_spill] sm:$0xff] %v1930_v13  ;;  %v1932_v12 = vpop.permute.xlu0 %400 }
 0x11e   :  { %2579 = vst [vmem:[#allocation107_spill] sm:$0xff] %v1932_v12  ;;  %812 = vrot.lane.b32.xlu1 %v1628_v30, %s1179_s12 }
 0x11f   :  { %748 = vrot.lane.b32.xlu0 %v1768_v38, %s1178_s11 }
 0x120   :  { %v1938_v50 = vpop.permute.xlu1 %406 }
 0x121   :  { %2580 = vst [vmem:[#allocation108_spill] sm:$0xff] %v1938_v50  ;;  %v1940_v56 = vpop.permute.xlu0 %404 }
 0x122   :  { %2581 = vst [vmem:[#allocation109_spill] sm:$0xff] %v1940_v56  ;;  %814 = vrot.lane.b32.xlu1 %v1623_v31, %s1179_s12 }
 0x123   :  { %750 = vrot.lane.b32.xlu0 %v1764_v63, %s1178_s11 }
 0x124   :  { %v1946_v4 = vpop.permute.xlu1 %410 }
 0x125   :  { %2582 = vst [vmem:[#allocation110_spill] sm:$0xff] %v1946_v4  ;;  %v1948_v13 = vpop.permute.xlu0 %408 }
 0x126   :  { %2583 = vst [vmem:[#allocation111_spill] sm:$0xff] %v1948_v13  ;;  %874 = vrot.lane.b32.xlu1 %v1748_v28, %s1179_s12 }
 0x127   :  { %872 = vrot.lane.b32.xlu0 %v1752_v41, %s1179_s12 }
 0x128   :  { %v1954_v12 = vpop.permute.xlu1 %414 }
 0x129   :  { %2584 = vst [vmem:[#allocation112_spill] sm:$0xff] %v1954_v12  ;;  %v1956_v50 = vpop.permute.xlu0 %412 }
 0x12a   :  { %2585 = vst [vmem:[#allocation113_spill] sm:$0xff] %v1956_v50  ;;  %816 = vrot.lane.b32.xlu1 %v1646_v46, %s1179_s12 }
 0x12b   :  { %752 = vrot.lane.b32.xlu0 %v1784_v22, %s1178_s11 }
 0x12c   :  { %v1962_v56 = vpop.permute.xlu1 %418 }
 0x12d   :  { %2586 = vst [vmem:[#allocation114_spill] sm:$0xff] %v1962_v56  ;;  %v1964_v4 = vpop.permute.xlu0 %416 }
 0x12e   :  { %2587 = vst [vmem:[#allocation115_spill] sm:$0xff] %v1964_v4  ;;  %754 = vrot.lane.b32.xlu1 %v1780_v54, %s1178_s11 }
 0x12f   :  { %876 = vrot.lane.b32.xlu0 %v1768_v38, %s1179_s12 }
 0x130   :  { %v1970_v13 = vpop.permute.xlu1 %422 }
 0x131   :  { %2588 = vst [vmem:[#allocation116_spill] sm:$0xff] %v1970_v13  ;;  %v1972_v12 = vpop.permute.xlu0 %420 }
 0x132   :  { %2589 = vst [vmem:[#allocation117_spill] sm:$0xff] %v1972_v12  ;;  %878 = vrot.lane.b32.xlu1 %v1764_v63, %s1179_s12 }
 0x133   :  { %818 = vrot.lane.b32.xlu0 %v1641_v47, %s1179_s12 }
 0x134   :  { %v1978_v50 = vpop.permute.xlu1 %538 }
 0x135   :  { %v1980_v56 = vpop.permute.xlu0 %536 }
 0x136   :  { %820 = vrot.lane.b32.xlu1 %v1664_v45, %s1179_s12 }
 0x137   :  { %756 = vrot.lane.b32.xlu0 %v1800_v55, %s1178_s11 }
 0x138   :  { %v1986_v4 = vpop.permute.xlu1 %542 }
 0x139   :  { %v1988_v13 = vpop.permute.xlu0 %540 }
 0x13a   :  { %758 = vrot.lane.b32.xlu1 %v1796_v6, %s1178_s11 }
 0x13b   :  { %880 = vrot.lane.b32.xlu0 %v1784_v22, %s1179_s12 }
 0x13c   :  { %v1994_v12 = vpop.permute.xlu1 %546 }
 0x13d   :  { %2590 = vst [vmem:[#allocation118_spill] sm:$0xff] %v1994_v12  ;;  %v1996_v47 = vpop.permute.xlu0 %544 }
 0x13e   :  { %882 = vrot.lane.b32.xlu1 %v1780_v54, %s1179_s12 }
 0x13f   :  { %822 = vrot.lane.b32.xlu0 %v1659_v44, %s1179_s12 }
 0x140   :  { %v2002_v45 = vpop.permute.xlu1 %550 }
 0x141   :  { %2591 = vst [vmem:[#allocation119_spill] sm:$0xff] %v2002_v45  ;;  %v2004_v46 = vpop.permute.xlu0 %548 }
 0x142   :  { %2592 = vst [vmem:[#allocation120_spill] sm:$0xff] %v2004_v46  ;;  %760 = vrot.lane.b32.xlu1 %v1816_v62, %s1178_s11 }
 0x143   :  { %700 = vrot.lane.b32.xlu0 %v1700_v27, %s1178_s11 }
 0x144   :  { %v2010_v22 = vpop.permute.xlu1 %554 }
 0x145   :  { %2593 = vst [vmem:[#allocation121_spill] sm:$0xff] %v2010_v22  ;;  %v2012_v12 = vpop.permute.xlu0 %552 }
 0x146   :  { %2594 = vst [vmem:[#allocation122_spill] sm:$0xff] %v2012_v12  ;;  %884 = vrot.lane.b32.xlu1 %v1800_v55, %s1179_s12 }
 0x147   :  { %824 = vrot.lane.b32.xlu0 %v1682_v42, %s1179_s12 }
 0x148   :  { %v2018_v44 = vpop.permute.xlu1 %558 }
 0x149   :  { %2595 = vst [vmem:[#allocation123_spill] sm:$0xff] %v2018_v44  ;;  %v2020_v45 = vpop.permute.xlu0 %556 }
 0x14a   :  { %2596 = vst [vmem:[#allocation124_spill] sm:$0xff] %v2020_v45  ;;  %762 = vrot.lane.b32.xlu1 %v1812_v23, %s1178_s11 }
 0x14b   :  { %702 = vrot.lane.b32.xlu0 %v1695_v26, %s1178_s11 }
 0x14c   :  { %v2026_v46 = vpop.permute.xlu1 %562 }
 0x14d   :  { %2597 = vst [vmem:[#allocation125_spill] sm:$0xff] %v2026_v46  ;;  %v2028_v22 = vpop.permute.xlu0 %560 }
 0x14e   :  { %2598 = vst [vmem:[#allocation126_spill] sm:$0xff] %v2028_v22  ;;  %886 = vrot.lane.b32.xlu1 %v1796_v6, %s1179_s12 }
 0x14f   :  { %826 = vrot.lane.b32.xlu0 %v1677_v61, %s1179_s12 }
 0x150   :  { %v2034_v12 = vpop.permute.xlu1 %566 }
 0x151   :  { %2599 = vst [vmem:[#allocation127_spill] sm:$0xff] %v2034_v12  ;;  %v2036_v44 = vpop.permute.xlu0 %564 }
 0x152   :  { %2600 = vst [vmem:[#allocation128_spill] sm:$0xff] %v2036_v44  ;;  %764 = vrot.lane.b32.xlu1 %v1832_v7, %s1178_s11 }
 0x153   :  { %704 = vrot.lane.b32.xlu0 %v1718_v43, %s1178_s11 }
 0x154   :  { %v2042_v45 = vpop.permute.xlu1 %618 }
 0x155   :  { %v2044_v46 = vpop.permute.xlu0 %616 }
 0x156   :  { %888 = vrot.lane.b32.xlu1 %v1816_v62, %s1179_s12 }
 0x157   :  { %828 = vrot.lane.b32.xlu0 %v1700_v27, %s1179_s12 }
 0x158   :  { %v2050_v22 = vpop.permute.xlu1 %622 }
 0x159   :  { %v2052_v12 = vpop.permute.xlu0 %620 }
 0x15a   :  { %766 = vrot.lane.b32.xlu1 %v1828_v39, %s1178_s11 }
 0x15b   :  { %706 = vrot.lane.b32.xlu0 %v1713_v58, %s1178_s11 }
 0x15c   :  { %v2058_v44 = vpop.permute.xlu1 %626 }
 0x15d   :  { %v2060_v61 = vpop.permute.xlu0 %624 }
 0x15e   :  { %890 = vrot.lane.b32.xlu1 %v1812_v23, %s1179_s12 }
 0x15f   :  { %830 = vrot.lane.b32.xlu0 %v1695_v26, %s1179_s12 }
 0x160   :  { %v2066_v27 = vpop.permute.xlu1 %630 }
 0x161   :  { %2601 = vst [vmem:[#allocation129_spill] sm:$0xff] %v2066_v27  ;;  %v2068_v62 = vpop.permute.xlu0 %628 }
 0x162   :  { %2602 = vst [vmem:[#allocation130_spill] sm:$0xff] %v2068_v62  ;;  %768 = vrot.lane.b32.xlu1 %v1848_v57, %s1178_s11  ;;  %v105_v62 = vadd.f32 %v1460_v35, %v1212_v3  ;;  %v106_v35 = vadd.f32 %v1450_v32, %v1193_v0  ;;  %v186_v0 = vadd.f32 %v1524_v51, %v1320_v19 }
 0x163   :  { %708 = vrot.lane.b32.xlu0 %v1736_v40, %s1178_s11 }
 0x164   :  { %v2074_v42 = vpop.permute.xlu1 %634 }
 0x165   :  { %2603 = vst [vmem:[#allocation131_spill] sm:$0xff] %v2074_v42  ;;  %v2076_v6 = vpop.permute.xlu0 %632 }
 0x166   :  { %2604 = vst [vmem:[#allocation132_spill] sm:$0xff] %v2076_v6  ;;  %892 = vrot.lane.b32.xlu1 %v1832_v7, %s1179_s12 }
 0x167   :  { %832 = vrot.lane.b32.xlu0 %v1718_v43, %s1179_s12 }
 0x168   :  { %v2082_v26 = vpop.permute.xlu1 %638 }
 0x169   :  { %2605 = vst [vmem:[#allocation133_spill] sm:$0xff] %v2082_v26  ;;  %v2084_v23 = vpop.permute.xlu0 %636 }
 0x16a   :  { %2606 = vst [vmem:[#allocation134_spill] sm:$0xff] %v2084_v23  ;;  %770 = vrot.lane.b32.xlu1 %v1844_v52, %s1178_s11 }
 0x16b   :  { %710 = vrot.lane.b32.xlu0 %v1731_v60, %s1178_s11 }
 0x16c   :  { %v2090_v27 = vpop.permute.xlu1 %642 }
 0x16d   :  { %2607 = vst [vmem:[#allocation135_spill] sm:$0xff] %v2090_v27  ;;  %v2092_v42 = vpop.permute.xlu0 %640 }
 0x16e   :  { %2608 = vst [vmem:[#allocation136_spill] sm:$0xff] %v2092_v42  ;;  %894 = vrot.lane.b32.xlu1 %v1828_v39, %s1179_s12 }
 0x16f   :  { %834 = vrot.lane.b32.xlu0 %v1713_v58, %s1179_s12 }
 0x170   :  { %v2098_v43 = vpop.permute.xlu1 %646 }
 0x171   :  { %2609 = vst [vmem:[#allocation137_spill] sm:$0xff] %v2098_v43  ;;  %v2100_v26 = vpop.permute.xlu0 %644 }
 0x172   :  { %2610 = vst [vmem:[#allocation138_spill] sm:$0xff] %v2100_v26  ;;  %836 = vrot.lane.b32.xlu1 %v1736_v40, %s1179_s12 }
 0x173   :  { %772 = vrot.lane.b32.xlu0 %v1864_v36, %s1178_s11 }
 0x174   :  { %v683_v23 = vpop.permute.xlu1 %682 }
 0x175   :  { %v681_v27 = vpop.permute.xlu0 %680 }
 0x176   :  { %774 = vrot.lane.b32.xlu1 %v1860_v21, %s1178_s11 }
 0x177   :  { %896 = vrot.lane.b32.xlu0 %v1848_v57, %s1179_s12 }
 0x178   :  { %v2110_v42 = vpop.permute.xlu1 %686 }
 0x179   :  { %v2112_v58 = vpop.permute.xlu0 %684 }
 0x17a   :  { %898 = vrot.lane.b32.xlu1 %v1844_v52, %s1179_s12 }
 0x17b   :  { %838 = vrot.lane.b32.xlu0 %v1731_v60, %s1179_s12  ;;  %v104_v60 = vadd.f32 %v1452_v33, %v1198_v1 }
 0x17c   :  { %v2118_v26 = vpop.permute.xlu1 %690 }
 0x17d   :  { %v2120_v43 = vpop.permute.xlu0 %688 }
 0x17e   :  { %902 = vrot.lane.b32.xlu1 %v1860_v21, %s1179_s12  ;;  %v248_v21 = vadd.f32 %v1580_v9, %v104_v60 }
 0x17f   :  { %900 = vrot.lane.b32.xlu0 %v1864_v36, %s1179_s12  ;;  %v185_v36 = vadd.f32 %v1514_v48, %v1304_v16 }
 0x180   :  { %v2126_v40 = vpop.permute.xlu1 %694 }
 0x181   :  { %2611 = vst [vmem:[#allocation139_spill] sm:$0xff] %v2126_v40  ;;  %v2128_v57 = vpop.permute.xlu0 %692  ;;  %v184_v40 = vadd.f32 %v1516_v49, %v1308_v17  ;;  %v313_v1 = vadd.f32 %v1702_v29, %v185_v36  ;;  %v250_v49 = vadd.f32 %v1588_v11, %v106_v35  ;;  %v2618_v11 = vld [vmem:[#allocation65_spill] sm:$0xff]  ;;  %v2621_v35 = vld [vmem:[#allocation104_spill] sm:$0xff] }
 0x182   :  { %2612 = vst [vmem:[#allocation140_spill] sm:$0xff] %v2128_v57 }
 0x183   :  { %v312_v33 = vadd.f32 %v1704_v59, %v184_v40  ;;  %v441_v16 = vadd.f32 %v1914_v37, %v313_v1  ;;  %v378_v32 = vadd.f32 %v1852_v53, %v250_v49  ;;  %v2615_v53 = vld [vmem:[#allocation30_spill] sm:$0xff] }
 0x184   :  { %v2130_v39 = vpop.permute.xlu1 %698 }
 0x185   :  { %2613 = vst [vmem:[#allocation141_spill] sm:$0xff] %v2130_v39  ;;  %v2132_v52 = vpop.permute.xlu0 %696  ;;  %v249_v39 = vadd.f32 %v1578_v8, %v105_v62  ;;  %v440_v48 = vadd.f32 %v1916_v5, %v312_v33  ;;  %v505_v36 = vadd.f32 %v1748_v28, %v441_v16  ;;  %v2616_v62 = vld [vmem:[#allocation89_spill] sm:$0xff]  ;;  %v2619_v33 = vld [vmem:[#allocation3_spill] sm:$0xff] }
 0x186   :  { %2614 = vst [vmem:[#allocation142_spill] sm:$0xff] %v2132_v52  ;;  %v376_v52 = vadd.f32 %v1836_v25, %v248_v21 }
 0x187   :  { %v377_v3 = vadd.f32 %v1834_v20, %v249_v39  ;;  %v107_v20 = vadd.f32 %v1458_v34, %v1207_v2  ;;  %v504_v37 = vadd.f32 %v1752_v41, %v440_v48  ;;  %v665_v2 = vadd.f32 %v2042_v45, %v505_v36  ;;  %v2624_v36 = vld [vmem:[#allocation18_spill] sm:$0xff] }
 0x188   :  { %v747_v7 = vpop.permute.xlu1 %746  ;;  %v472_v17 = vadd.f32 %v1610_v15, %v376_v52  ;;  %v314_v52 = vadd.f32 %v1722_v24, %v186_v0  ;;  %v474_v41 = vadd.f32 %v1628_v30, %v378_v32 }
 0x189   :  { %v745_v6 = vpop.permute.xlu0 %744  ;;  %v473_v60 = vadd.f32 %v1605_v14, %v377_v3  ;;  %v251_v40 = vadd.f32 %v1586_v10, %v107_v20  ;;  %v664_v34 = vadd.f32 %v2044_v46, %v504_v37  ;;  %v793_v9 = vadd.f32 %v747_v7, %v665_v2 }
 0x18a   :  { %v584_v29 = vadd.f32 %v1980_v56, %v472_v17  ;;  %v586_v46 = vadd.f32 %v1988_v13, %v474_v41  ;;  %v2622_v17 = vld [vmem:[#allocation44_spill] sm:$0xff] }
 0x18b   :  { %v585_v5 = vadd.f32 %v1978_v50, %v473_v60  ;;  %v187_v50 = vadd.f32 %v2615_v53, %v1316_v18  ;;  %v379_v28 = vadd.f32 %v2616_v62, %v251_v40  ;;  %v792_v10 = vadd.f32 %v745_v6, %v664_v34  ;;  %v2620_v18 = vld [vmem:[#allocation19_spill] sm:$0xff] }
 0x18c   :  { %v811_v57 = vpop.permute.xlu1 %810  ;;  %v728_v39 = vadd.f32 %v681_v27, %v584_v29  ;;  %v2617_v27 = vld [vmem:[#allocation105_spill] sm:$0xff]  ;;  %v108_v3 = vadd.f32 %v2620_v18, %v2619_v33  ;;  %v730_v7 = vadd.f32 %v2112_v58, %v586_v46 }
 0x18d   :  { %v809_v55 = vpop.permute.xlu0 %808  ;;  %v729_v19 = vadd.f32 %v683_v23, %v585_v5  ;;  %v442_v8 = vadd.f32 %v2617_v27, %v314_v52  ;;  %v315_v14 = vadd.f32 %v2618_v11, %v187_v50  ;;  %v475_v30 = vadd.f32 %v1623_v31, %v379_v28  ;;  %v2623_v31 = vld [vmem:[#allocation2_spill] sm:$0xff]  ;;  %v2627_v52 = vld [vmem:[#allocation93_spill] sm:$0xff] }
 0x18e   :  { %v856_v51 = vadd.f32 %v809_v55, %v728_v39  ;;  %v252_v49 = vadd.f32 %v2622_v17, %v108_v3  ;;  %v109_v37 = vadd.f32 %v2624_v36, %v2623_v31  ;;  %v2626_v39 = vld [vmem:[#allocation32_spill] sm:$0xff] }
 0x18f   :  { %v857_v24 = vadd.f32 %v811_v57, %v729_v19  ;;  %v443_v16 = vadd.f32 %v2621_v35, %v315_v14  ;;  %v506_v6 = vadd.f32 %v1768_v38, %v442_v8  ;;  %v587_v13 = vadd.f32 %v1986_v4, %v475_v30  ;;  %v2625_v38 = vld [vmem:[#allocation7_spill] sm:$0xff]  ;;  %v2634_v14 = vld [vmem:[#allocation50_spill] sm:$0xff]  ;;  %v2636_v35 = vld [vmem:[#allocation5_spill] sm:$0xff] }
 0x190   :  { %v813_v21 = vpop.permute.xlu1 %812  ;;  %v936_v23 = vmul.f32 %v856_v51, %v856_v51  ;;  %v188_v58 = vadd.f32 %v2626_v39, %v2625_v38  ;;  %v380_v2 = vadd.f32 %v2627_v52, %v252_v49  ;;  %v2628_v19 = vld [vmem:[#allocation43_spill] sm:$0xff]  ;;  %v2643_v39 = vld [vmem:[#allocation9_spill] sm:$0xff] }
 0x191   :  { %v749_v25 = vpop.permute.xlu0 %748  ;;  %v937_v57 = vmul.f32 %v857_v24, %v857_v24  ;;  %v666_v20 = vadd.f32 %v2052_v12, %v506_v6  ;;  %v858_v0 = vadd.f32 %v813_v21, %v730_v7  ;;  %v507_v40 = vadd.f32 %v1764_v63, %v443_v16  ;;  %v2629_v21 = vld [vmem:[#allocation69_spill] sm:$0xff]  ;;  %v2630_v63 = vld [vmem:[#allocation6_spill] sm:$0xff]  ;;  %v2632_v24 = vld [vmem:[#allocation92_spill] sm:$0xff] }
 0x192   :  { %v731_v4 = vadd.f32 %v2110_v42, %v587_v13  ;;  %v253_v12 = vadd.f32 %v2628_v19, %v109_v37  ;;  %v316_v51 = vadd.f32 %v2629_v21, %v188_v58  ;;  %v2633_v42 = vld [vmem:[#allocation107_spill] sm:$0xff]  ;;  %v2637_v16 = vld [vmem:[#allocation21_spill] sm:$0xff]  ;;  %v2644_v58 = vld [vmem:[#allocation34_spill] sm:$0xff] }
 0x193   :  { %v794_v34 = vadd.f32 %v749_v25, %v666_v20  ;;  %v667_v53 = vadd.f32 %v2050_v22, %v507_v40  ;;  %v938_v28 = vmul.f32 %v858_v0, %v858_v0  ;;  %v2635_v22 = vld [vmem:[#allocation68_spill] sm:$0xff]  ;;  %v110_v30 = vadd.f32 %v2637_v16, %v2636_v35  ;;  %v2638_v6 = vld [vmem:[#allocation49_spill] sm:$0xff]  ;;  %v2641_v20 = vld [vmem:[#allocation46_spill] sm:$0xff] }
 0x194   :  { %v815_v56 = vpop.permute.xlu1 %814  ;;  %v381_v11 = vadd.f32 %v2632_v24, %v253_v12  ;;  %v444_v25 = vadd.f32 %v2633_v42, %v316_v51  ;;  %v190_v40 = vadd.f32 %v2644_v58, %v2643_v39  ;;  %v2645_v52 = vld [vmem:[#allocation95_spill] sm:$0xff]  ;;  %v2663_v39 = vld [vmem:[#allocation48_spill] sm:$0xff] }
 0x195   :  { %v751_v59 = vpop.permute.xlu0 %750  ;;  %v859_v41 = vadd.f32 %v815_v56, %v731_v4  ;;  %v254_v0 = vadd.f32 %v2641_v20, %v110_v30  ;;  %v2646_v19 = vld [vmem:[#allocation71_spill] sm:$0xff]  ;;  %v2658_v30 = vld [vmem:[#allocation70_spill] sm:$0xff]  ;;  %v2661_v20 = vld [vmem:[#allocation108_spill] sm:$0xff] }
 0x196   :  { %v477_v7 = vadd.f32 %v2638_v6, %v381_v11  ;;  %v318_v12 = vadd.f32 %v2646_v19, %v190_v40  ;;  %v2664_v40 = vld [vmem:[#allocation119_spill] sm:$0xff]  ;;  %v2667_v19 = vld [vmem:[#allocation97_spill] sm:$0xff] }
 0x197   :  { %v939_v33 = vmul.f32 %v859_v41, %v859_v41  ;;  %v2648_v41 = vld [vmem:[#allocation20_spill] sm:$0xff] }
 0x198   :  { %v875_v15 = vpop.permute.xlu1 %874 }
 0x199   :  { %v873_v45 = vpop.permute.xlu0 %872  ;;  %v921_v55 = vadd.f32 %v875_v15, %v793_v9  ;;  %v2631_v9 = vld [vmem:[#allocation31_spill] sm:$0xff]  ;;  %v476_v15 = vadd.f32 %v2634_v14, %v380_v2  ;;  %v382_v2 = vadd.f32 %v2645_v52, %v254_v0 }
 0x19a   :  { %v920_v1 = vadd.f32 %v873_v45, %v792_v10  ;;  %v189_v10 = vadd.f32 %v2631_v9, %v2630_v63  ;;  %v795_v45 = vadd.f32 %v751_v59, %v667_v53  ;;  %v2640_v59 = vld [vmem:[#allocation74_spill] sm:$0xff] }
 0x19b   :  { %v953_v32 = vsub.f32 %v937_v57, %v921_v55  ;;  %v588_v56 = vadd.f32 %v1996_v47, %v476_v15  ;;  %v2639_v57 = vld [vmem:[#allocation106_spill] sm:$0xff]  ;;  %v508_v17 = vadd.f32 %v2640_v59, %v444_v25  ;;  %v2652_v25 = vld [vmem:[#allocation120_spill] sm:$0xff] }
 0x19c   :  { %v952_v48 = vsub.f32 %v936_v23, %v920_v1  ;;  %v817_v60 = vpop.permute.xlu1 %816  ;;  %v317_v23 = vadd.f32 %v2635_v22, %v189_v10  ;;  %v2650_v9 = vld [vmem:[#allocation54_spill] sm:$0xff]  ;;  %v2654_v22 = vld [vmem:[#allocation33_spill] sm:$0xff] }
 0x19d   :  { %v753_v29 = vpop.permute.xlu0 %752  ;;  %v972_v8 = vsel %vm968_vm0, %v953_v32, 0.0  ;;  %v732_v49 = vadd.f32 %v2120_v43, %v588_v56  ;;  %v668_v36 = vadd.f32 %v2060_v61, %v508_v17  ;;  %v478_v10 = vadd.f32 %v2650_v9, %v382_v2  ;;  %v2656_v56 = vld [vmem:[#allocation78_spill] sm:$0xff] }
 0x19e   :  { %v969_v5 = vsel %vm968_vm0, %v952_v48, 0.0  ;;  %v445_v48 = vadd.f32 %v2639_v57, %v317_v23  ;;  %v1169_v17 = vld [vmem:[%s2433_s0 + $0x80] sm:$0xff] }
 0x19f   :  { %970 = vadd.xlane.f32.xlu0 %v969_v5  ;;  %v2642_v5 = vld [vmem:[#allocation118_spill] sm:$0xff]  ;;  %v860_v37 = vadd.f32 %v817_v60, %v732_v49  ;;  %v590_v14 = vadd.f32 %v2652_v25, %v478_v10  ;;  %v2660_v49 = vld [vmem:[#allocation23_spill] sm:$0xff] }
 0x1a0   :  { %v755_v50 = vpop.permute.xlu1 %754  ;;  %v589_v31 = vadd.f32 %v2642_v5, %v477_v7  ;;  %v509_v43 = vadd.f32 %v1780_v54, %v445_v48  ;;  %v2659_v7 = vld [vmem:[#allocation130_spill] sm:$0xff]  ;;  %v2662_v5 = vld [vmem:[#allocation53_spill] sm:$0xff] }
 0x1a1   :  { %v877_v62 = vpop.permute.xlu0 %876  ;;  %v940_v60 = vmul.f32 %v860_v37, %v860_v37  ;;  %v2674_v25 = vld [vmem:[#allocation58_spill] sm:$0xff] }
 0x1a2   :  { %v922_v27 = vadd.f32 %v877_v62, %v794_v34  ;;  %973 = vadd.xlane.f32.xlu1 %v972_v8  ;;  %v733_v4 = vadd.f32 %v2118_v26, %v589_v31  ;;  %v796_v34 = vadd.f32 %v753_v29, %v668_v36  ;;  %v669_v61 = vadd.f32 %v2058_v44, %v509_v43  ;;  %v2649_v8 = vld [vmem:[#allocation109_spill] sm:$0xff]  ;;  %v2665_v43 = vld [vmem:[#allocation11_spill] sm:$0xff] }
 0x1a3   :  { %v446_v63 = vadd.f32 %v2649_v8, %v318_v12  ;;  %v2651_v26 = vld [vmem:[#allocation45_spill] sm:$0xff] }
 0x1a4   :  { %v954_v46 = vsub.f32 %v938_v28, %v922_v27  ;;  %v879_v55 = vpop.permute.xlu1 %878  ;;  %v2647_v28 = vld [vmem:[#allocation4_spill] sm:$0xff]  ;;  %v797_v54 = vadd.f32 %v755_v50, %v669_v61  ;;  %v2671_v8 = vld [vmem:[#allocation129_spill] sm:$0xff] }
 0x1a5   :  { %v819_v1 = vpop.permute.xlu0 %818  ;;  %v923_v18 = vadd.f32 %v879_v55, %v795_v45  ;;  %v111_v27 = vadd.f32 %v2648_v41, %v2647_v28  ;;  %v2655_v55 = vld [vmem:[#allocation94_spill] sm:$0xff]  ;;  %v2657_v50 = vld [vmem:[#allocation140_spill] sm:$0xff]  ;;  %v2670_v41 = vld [vmem:[#allocation73_spill] sm:$0xff] }
 0x1a6   :  { %v975_v3 = vsel %vm968_vm0, %v954_v46, 0.0  ;;  %v861_v53 = vadd.f32 %v819_v1, %v733_v4  ;;  %v2653_v46 = vld [vmem:[#allocation8_spill] sm:$0xff] }
 0x1a7   :  { %976 = vadd.xlane.f32.xlu0 %v975_v3  ;;  %v955_v13 = vsub.f32 %v939_v33, %v923_v18  ;;  %v255_v29 = vadd.f32 %v2651_v26, %v111_v27  ;;  %v191_v23 = vadd.f32 %v2654_v22, %v2653_v46  ;;  %v510_v33 = vadd.f32 %v2656_v56, %v446_v63  ;;  %v2666_v4 = vld [vmem:[#allocation36_spill] sm:$0xff]  ;;  %v2675_v46 = vld [vmem:[#allocation47_spill] sm:$0xff]  ;;  %v2677_v56 = vld [vmem:[#allocation10_spill] sm:$0xff] }
 0x1a8   :  { %v821_v47 = vpop.permute.xlu1 %820  ;;  %v941_v15 = vmul.f32 %v861_v53, %v861_v53  ;;  %v734_v18 = vadd.f32 %v2657_v50, %v590_v14 }
 0x1a9   :  { %v757_v32 = vpop.permute.xlu0 %756  ;;  %v978_v38 = vsel %vm968_vm0, %v955_v13, 0.0  ;;  %v383_v1 = vadd.f32 %v2655_v55, %v255_v29  ;;  %v319_v6 = vadd.f32 %v2658_v30, %v191_v23  ;;  %v670_v57 = vadd.f32 %v2659_v7, %v510_v33  ;;  %v2673_v29 = vld [vmem:[#allocation111_spill] sm:$0xff]  ;;  %v2676_v23 = vld [vmem:[#allocation122_spill] sm:$0xff] }
 0x1aa   :  { %v862_v48 = vadd.f32 %v821_v47, %v734_v18  ;;  %v112_v13 = vadd.f32 %v1169_v17, %v2660_v49  ;;  %v2678_v33 = vld [vmem:[#allocation35_spill] sm:$0xff]  ;;  %v2679_v18 = vld [vmem:[#allocation96_spill] sm:$0xff]  ;;  %v2680_v30 = vld [vmem:[#allocation82_spill] sm:$0xff] }
 0x1ab   :  { %979 = vadd.xlane.f32.xlu0 %v978_v38  ;;  %v447_v0 = vadd.f32 %v2661_v20, %v319_v6  ;;  %v479_v31 = vadd.f32 %v2662_v5, %v383_v1  ;;  %v798_v36 = vadd.f32 %v757_v32, %v670_v57  ;;  %v193_v50 = vadd.f32 %v2678_v33, %v2677_v56  ;;  %v2681_v7 = vld [vmem:[#allocation142_spill] sm:$0xff]  ;;  %v2682_v17 = vld [vmem:[#allocation72_spill] sm:$0xff] }
 0x1ac   :  { %v759_v21 = vpop.permute.xlu1 %758  ;;  %v256_v58 = vadd.f32 %v2663_v39, %v112_v13  ;;  %v942_v52 = vmul.f32 %v862_v48, %v862_v48  ;;  %v2683_v13 = vld [vmem:[#allocation132_spill] sm:$0xff]  ;;  %v2685_v39 = vld [vmem:[#allocation110_spill] sm:$0xff] }
 0x1ad   :  { %v881_v51 = vpop.permute.xlu0 %880  ;;  %v591_v47 = vadd.f32 %v2664_v40, %v479_v31  ;;  %v321_v49 = vadd.f32 %v2682_v17, %v193_v50  ;;  %v1171_v31 = vld [vmem:[%s2433_s0 + $0xa0] sm:$0xff]  ;;  %v2686_v40 = vld [vmem:[#allocation57_spill] sm:$0xff]  ;;  %v2699_v50 = vld [vmem:[#allocation51_spill] sm:$0xff] }
 0x1ae   :  { %v924_v62 = vadd.f32 %v881_v51, %v796_v34  ;;  %v192_v34 = vadd.f32 %v2666_v4, %v2665_v43  ;;  %v384_v12 = vadd.f32 %v2667_v19, %v256_v58  ;;  %v2668_v51 = vld [vmem:[#allocation77_spill] sm:$0xff]  ;;  %v2687_v4 = vld [vmem:[#allocation52_spill] sm:$0xff]  ;;  %v2703_v17 = vld [vmem:[#allocation98_spill] sm:$0xff] }
 0x1af   :  { %v511_v61 = vadd.f32 %v2668_v51, %v447_v0  ;;  %v449_v58 = vadd.f32 %v2685_v39, %v321_v49  ;;  %v2688_v19 = vld [vmem:[#allocation121_spill] sm:$0xff]  ;;  %v2706_v39 = vld [vmem:[#allocation134_spill] sm:$0xff] }
 0x1b0   :  { %v956_v24 = vsub.f32 %v940_v60, %v924_v62  ;;  %v883_v11 = vpop.permute.xlu1 %882  ;;  %v2669_v60 = vld [vmem:[#allocation139_spill] sm:$0xff]  ;;  %v320_v27 = vadd.f32 %v2670_v41, %v192_v34  ;;  %v480_v14 = vadd.f32 %v2674_v25, %v384_v12 }
 0x1b1   :  { %v823_v42 = vpop.permute.xlu0 %822  ;;  %v925_v44 = vadd.f32 %v883_v11, %v797_v54  ;;  %v735_v53 = vadd.f32 %v2669_v60, %v591_v47  ;;  %v671_v63 = vadd.f32 %v2671_v8, %v511_v61  ;;  %v1170_v54 = vld [vmem:[%s2433_s0 + $0x90] sm:$0xff]  ;;  %v2689_v61 = vld [vmem:[#allocation13_spill] sm:$0xff]  ;;  %v2690_v60 = vld [vmem:[#allocation38_spill] sm:$0xff] }
 0x1b2   :  { %v981_v45 = vsel %vm968_vm0, %v956_v24, 0.0  ;;  %v2672_v24 = vld [vmem:[#allocation22_spill] sm:$0xff]  ;;  %v448_v11 = vadd.f32 %v2673_v29, %v320_v27  ;;  %v2692_v27 = vld [vmem:[#allocation81_spill] sm:$0xff]  ;;  %v2695_v29 = vld [vmem:[#allocation131_spill] sm:$0xff] }
 0x1b3   :  { %982 = vadd.xlane.f32.xlu1 %v981_v45  ;;  %v957_v3 = vsub.f32 %v941_v15, %v925_v44  ;;  %v863_v9 = vadd.f32 %v823_v42, %v735_v53  ;;  %v113_v26 = vadd.f32 %v1170_v54, %v2672_v24  ;;  %v799_v15 = vadd.f32 %v759_v21, %v671_v63  ;;  %v2693_v63 = vld [vmem:[#allocation141_spill] sm:$0xff]  ;;  %v2694_v24 = vld [vmem:[#allocation76_spill] sm:$0xff] }
 0x1b4   :  { %v761_v35 = vpop.permute.xlu1 %760  ;;  %v592_v42 = vadd.f32 %v2676_v23, %v480_v14  ;;  %v512_v6 = vadd.f32 %v2680_v30, %v448_v11  ;;  %v194_v53 = vadd.f32 %v2690_v60, %v2689_v61  ;;  %v513_v8 = vadd.f32 %v2692_v27, %v449_v58  ;;  %v2710_v60 = vld [vmem:[#allocation56_spill] sm:$0xff] }
 0x1b5   :  { %v2233_v16 = vpop.permute.xlu0 %700  ;;  %v984_v59 = vsel %vm968_vm0, %v957_v3, 0.0  ;;  %v257_v22 = vadd.f32 %v2675_v46, %v113_v26  ;;  %v943_v55 = vmul.f32 %v863_v9, %v863_v9 }
 0x1b6   :  { %985 = vadd.xlane.f32.xlu0 %v984_v59  ;;  %v736_v57 = vadd.f32 %v2681_v7, %v592_v42  ;;  %v672_v20 = vadd.f32 %v2683_v13, %v512_v6  ;;  %v322_v26 = vadd.f32 %v2694_v24, %v194_v53  ;;  %v673_v11 = vadd.f32 %v2695_v29, %v513_v8  ;;  %v2698_v42 = vld [vmem:[#allocation62_spill] sm:$0xff]  ;;  %v2701_v7 = vld [vmem:[#allocation12_spill] sm:$0xff]  ;;  %v2715_v29 = vld [vmem:[#allocation101_spill] sm:$0xff] }
 0x1b7   :  { %v385_v3 = vadd.f32 %v2679_v18, %v257_v22  ;;  %v2697_v22 = vld [vmem:[#allocation113_spill] sm:$0xff]  ;;  %v2704_v13 = vld [vmem:[#allocation86_spill] sm:$0xff]  ;;  %v1174_v8 = vld [vmem:[%s2433_s0 + $0xd0] sm:$0xff] }
 0x1b8   :  { %v885_v37 = vpop.permute.xlu1 %884  ;;  %v450_v23 = vadd.f32 %v2697_v22, %v322_v26  ;;  %v2714_v24 = vld [vmem:[#allocation40_spill] sm:$0xff] }
 0x1b9   :  { %v825_v38 = vpop.permute.xlu0 %824  ;;  %v926_v2 = vadd.f32 %v885_v37, %v798_v36  ;;  %v2684_v36 = vld [vmem:[#allocation25_spill] sm:$0xff]  ;;  %v481_v47 = vadd.f32 %v2686_v40, %v385_v3  ;;  %v2700_v3 = vld [vmem:[#allocation124_spill] sm:$0xff] }
 0x1ba   :  { %v864_v0 = vadd.f32 %v825_v38, %v736_v57  ;;  %v114_v37 = vadd.f32 %v1171_v31, %v2684_v36  ;;  %v2702_v57 = vld [vmem:[#allocation37_spill] sm:$0xff]  ;;  %v2705_v36 = vld [vmem:[#allocation75_spill] sm:$0xff] }
 0x1bb   :  { %v958_v62 = vsub.f32 %v942_v52, %v926_v2  ;;  %v800_v52 = vadd.f32 %v761_v35, %v672_v20  ;;  %v593_v38 = vadd.f32 %v2688_v19, %v481_v47  ;;  %v514_v20 = vadd.f32 %v2704_v13, %v450_v23  ;;  %v2709_v19 = vld [vmem:[#allocation61_spill] sm:$0xff]  ;;  %v2725_v13 = vld [vmem:[#allocation115_spill] sm:$0xff] }
 0x1bc   :  { %v763_v28 = vpop.permute.xlu1 %762  ;;  %v258_v34 = vadd.f32 %v2687_v4, %v114_v37  ;;  %v944_v12 = vmul.f32 %v864_v0, %v864_v0 }
 0x1bd   :  { %v2251_v32 = vpop.permute.xlu0 %702  ;;  %v987_v10 = vsel %vm968_vm0, %v958_v62, 0.0  ;;  %v2691_v62 = vld [vmem:[#allocation99_spill] sm:$0xff]  ;;  %v737_v9 = vadd.f32 %v2693_v63, %v593_v38  ;;  %v674_v58 = vadd.f32 %v2706_v39, %v514_v20  ;;  %v2712_v63 = vld [vmem:[#allocation26_spill] sm:$0xff]  ;;  %v2728_v39 = vld [vmem:[#allocation41_spill] sm:$0xff] }
 0x1be   :  { %988 = vadd.xlane.f32.xlu1 %v987_v10  ;;  %v386_v41 = vadd.f32 %v2691_v62, %v258_v34  ;;  %v2711_v62 = vld [vmem:[#allocation123_spill] sm:$0xff] }
 0x1c0   :  { %v887_v44 = vpop.permute.xlu1 %886 }
 0x1c1   :  { %v827_v45 = vpop.permute.xlu0 %826  ;;  %v927_v1 = vadd.f32 %v887_v44, %v799_v15  ;;  %v1172_v15 = vld [vmem:[%s2433_s0 + $0xb0] sm:$0xff] }
 0x1c2   :  { %v865_v25 = vadd.f32 %v827_v45, %v737_v9  ;;  %v2696_v44 = vld [vmem:[#allocation24_spill] sm:$0xff]  ;;  %v117_v9 = vadd.f32 %v1174_v8, %v2712_v63  ;;  %v2737_v63 = vld [vmem:[#allocation63_spill] sm:$0xff] }
 0x1c3   :  { %v959_v48 = vsub.f32 %v943_v55, %v927_v1  ;;  %v115_v46 = vadd.f32 %v1172_v15, %v2696_v44  ;;  %v482_v55 = vadd.f32 %v2698_v42, %v386_v41  ;;  %v801_v1 = vadd.f32 %v763_v28, %v673_v11  ;;  %v2717_v44 = vld [vmem:[#allocation55_spill] sm:$0xff]  ;;  %v2718_v42 = vld [vmem:[#allocation80_spill] sm:$0xff] }
 0x1c4   :  { %v765_v59 = vpop.permute.xlu1 %764  ;;  %v945_v30 = vmul.f32 %v865_v25, %v865_v25 }
 0x1c5   :  { %v2269_v21 = vpop.permute.xlu0 %704  ;;  %v990_v5 = vsel %vm968_vm0, %v959_v48, 0.0  ;;  %v259_v18 = vadd.f32 %v2699_v50, %v115_v46  ;;  %v594_v45 = vadd.f32 %v2700_v3, %v482_v55  ;;  %v195_v48 = vadd.f32 %v2702_v57, %v2701_v7  ;;  %v1175_v3 = vld [vmem:[%s2433_s0 + $0xf0] sm:$0xff] }
 0x1c6   :  { %991 = vadd.xlane.f32.xlu0 %v990_v5  ;;  %v261_v46 = vadd.f32 %v2717_v44, %v117_v9  ;;  %v2722_v57 = vld [vmem:[#allocation100_spill] sm:$0xff] }
 0x1c7   :  { %v387_v49 = vadd.f32 %v2703_v17, %v259_v18  ;;  %v738_v0 = vadd.f32 %v2233_v16, %v594_v45  ;;  %v323_v37 = vadd.f32 %v2705_v36, %v195_v48  ;;  %v2708_v16 = vld [vmem:[#allocation112_spill] sm:$0xff]  ;;  %v2723_v17 = vld [vmem:[#allocation14_spill] sm:$0xff] }
 0x1c8   :  { %v889_v2 = vpop.permute.xlu1 %888  ;;  %v2720_v45 = vld [vmem:[#allocation28_spill] sm:$0xff]  ;;  %v389_v48 = vadd.f32 %v2722_v57, %v261_v46  ;;  %v2747_v57 = vld [vmem:[#allocation67_spill] sm:$0xff] }
 0x1c9   :  { %v829_v43 = vpop.permute.xlu0 %828  ;;  %v928_v51 = vadd.f32 %v889_v2, %v800_v52  ;;  %v1173_v52 = vld [vmem:[%s2433_s0 + $0xc0] sm:$0xff]  ;;  %v2707_v2 = vld [vmem:[#allocation27_spill] sm:$0xff]  ;;  %v451_v34 = vadd.f32 %v2708_v16, %v323_v37  ;;  %v483_v38 = vadd.f32 %v2709_v19, %v387_v49  ;;  %v2727_v37 = vld [vmem:[#allocation16_spill] sm:$0xff] }
 0x1ca   :  { %v866_v40 = vadd.f32 %v829_v43, %v738_v0  ;;  %v116_v4 = vadd.f32 %v1173_v52, %v2707_v2  ;;  %v2724_v49 = vld [vmem:[#allocation39_spill] sm:$0xff]  ;;  %v2726_v0 = vld [vmem:[#allocation64_spill] sm:$0xff]  ;;  %v485_v9 = vadd.f32 %v2737_v63, %v389_v48 }
 0x1cb   :  { %v960_v10 = vsub.f32 %v944_v12, %v928_v51  ;;  %v802_v12 = vadd.f32 %v765_v59, %v674_v58  ;;  %v595_v43 = vadd.f32 %v2711_v62, %v483_v38  ;;  %v2716_v59 = vld [vmem:[#allocation85_spill] sm:$0xff]  ;;  %v199_v58 = vadd.f32 %v2728_v39, %v2727_v37  ;;  %v2730_v52 = vld [vmem:[#allocation60_spill] sm:$0xff]  ;;  %v2732_v38 = vld [vmem:[#allocation126_spill] sm:$0xff] }
 0x1cc   :  { %v2287_v54 = vpop.permute.xlu1 %766  ;;  %v260_v53 = vadd.f32 %v2710_v60, %v116_v4  ;;  %v946_v41 = vmul.f32 %v866_v40, %v866_v40  ;;  %v515_v25 = vadd.f32 %v2716_v59, %v451_v34  ;;  %v2729_v40 = vld [vmem:[#allocation59_spill] sm:$0xff]  ;;  %v2734_v62 = vld [vmem:[#allocation42_spill] sm:$0xff] }
 0x1cd   :  { %v2289_v35 = vpop.permute.xlu0 %706  ;;  %v993_v14 = vsel %vm968_vm0, %v960_v10, 0.0  ;;  %v2713_v10 = vld [vmem:[#allocation15_spill] sm:$0xff] }
 0x1ce   :  { %994 = vadd.xlane.f32.xlu1 %v993_v14  ;;  %v196_v26 = vadd.f32 %v2714_v24, %v2713_v10  ;;  %v388_v11 = vadd.f32 %v2715_v29, %v260_v53  ;;  %v739_v14 = vadd.f32 %v2251_v32, %v595_v43  ;;  %v1176_v32 = vld [vmem:[%s2433_s0 + $0xe0] sm:$0xff]  ;;  %v2731_v34 = vld [vmem:[#allocation79_spill] sm:$0xff]  ;;  %v2733_v53 = vld [vmem:[#allocation17_spill] sm:$0xff] }
 0x1cf   :  { %v198_v43 = vadd.f32 %v2734_v62, %v2733_v53  ;;  %v2738_v10 = vld [vmem:[#allocation114_spill] sm:$0xff]  ;;  %v2751_v39 = vld [vmem:[#allocation135_spill] sm:$0xff] }
 0x1d0   :  { %v891_v56 = vpop.permute.xlu1 %890  ;;  %v324_v55 = vadd.f32 %v2718_v42, %v196_v26  ;;  %v2739_v26 = vld [vmem:[#allocation88_spill] sm:$0xff]  ;;  %v2755_v53 = vld [vmem:[#allocation138_spill] sm:$0xff] }
 0x1d1   :  { %v831_v33 = vpop.permute.xlu0 %830  ;;  %v929_v6 = vadd.f32 %v891_v56, %v801_v1  ;;  %v2719_v1 = vld [vmem:[#allocation133_spill] sm:$0xff] }
 0x1d2   :  { %v675_v56 = vadd.f32 %v2719_v1, %v515_v25  ;;  %v867_v50 = vadd.f32 %v831_v33, %v739_v14  ;;  %v197_v33 = vadd.f32 %v2724_v49, %v2723_v17  ;;  %v452_v20 = vadd.f32 %v2725_v13, %v324_v55  ;;  %v2740_v25 = vld [vmem:[#allocation83_spill] sm:$0xff]  ;;  %v2742_v55 = vld [vmem:[#allocation125_spill] sm:$0xff] }
 0x1d3   :  { %v961_v5 = vsub.f32 %v945_v30, %v929_v6  ;;  %v119_v30 = vadd.f32 %v1175_v3, %v2720_v45  ;;  %v2721_v6 = vld [vmem:[#allocation29_spill] sm:$0xff]  ;;  %v327_v14 = vadd.f32 %v2740_v25, %v199_v58  ;;  %v597_v1 = vadd.f32 %v2742_v55, %v485_v9  ;;  %v2744_v45 = vld [vmem:[#allocation116_spill] sm:$0xff]  ;;  %v2748_v17 = vld [vmem:[#allocation87_spill] sm:$0xff] }
 0x1d4   :  { %v2307_v31 = vpop.permute.xlu1 %768  ;;  %v118_v7 = vadd.f32 %v1176_v32, %v2721_v6  ;;  %v803_v36 = vadd.f32 %v2287_v54, %v675_v56  ;;  %v325_v19 = vadd.f32 %v2731_v34, %v197_v33  ;;  %v516_v29 = vadd.f32 %v2739_v26, %v452_v20  ;;  %v2743_v56 = vld [vmem:[#allocation136_spill] sm:$0xff]  ;;  %v2745_v32 = vld [vmem:[#allocation117_spill] sm:$0xff]  ;;  %v2749_v20 = vld [vmem:[#allocation127_spill] sm:$0xff] }
 0x1d5   :  { %v2309_v28 = vpop.permute.xlu0 %708  ;;  %v996_v47 = vsel %vm968_vm0, %v961_v5, 0.0  ;;  %v484_v5 = vadd.f32 %v2726_v0, %v388_v11  ;;  %v741_v33 = vadd.f32 %v2289_v35, %v597_v1  ;;  %v2753_v34 = vld [vmem:[#allocation91_spill] sm:$0xff]  ;;  %v1049_v55 = vlaneseq }
 0x1d6   :  { %997 = vadd.xlane.f32.xlu0 %v996_v47  ;;  %v263_v47 = vadd.f32 %v2729_v40, %v119_v30  ;;  %v262_v2 = vadd.f32 %v2730_v52, %v118_v7  ;;  %v453_v24 = vadd.f32 %v2738_v10, %v325_v19  ;;  %v455_v30 = vadd.f32 %v2744_v45, %v327_v14  ;;  %v2746_v7 = vld [vmem:[#allocation66_spill] sm:$0xff] }
 0x1d8   :  { %v893_v51 = vpop.permute.xlu1 %892  ;;  %v517_v49 = vadd.f32 %v2748_v17, %v453_v24 }
 0x1d9   :  { %v833_v61 = vpop.permute.xlu0 %832  ;;  %v930_v27 = vadd.f32 %v893_v51, %v802_v12  ;;  %v596_v12 = vadd.f32 %v2732_v38, %v484_v5  ;;  %v947_v51 = vmul.f32 %v867_v50, %v867_v50  ;;  %v676_v50 = vadd.f32 %v2743_v56, %v516_v29 }
 0x1da   :  { %v677_v58 = vadd.f32 %v2751_v39, %v517_v49 }
 0x1db   :  { %v962_v15 = vsub.f32 %v946_v41, %v930_v27  ;;  %v2735_v41 = vld [vmem:[#allocation102_spill] sm:$0xff]  ;;  %v2736_v27 = vld [vmem:[#allocation103_spill] sm:$0xff]  ;;  %v740_v11 = vadd.f32 %v2269_v21, %v596_v12  ;;  %v804_v13 = vadd.f32 %v2307_v31, %v676_v50  ;;  %v2387_v50 = vand.u32 127, %v1049_v55 }
 0x1dc   :  { %v771_v22 = vpop.permute.xlu1 %770  ;;  %v391_v54 = vadd.f32 %v2735_v41, %v263_v47  ;;  %v390_v8 = vadd.f32 %v2736_v27, %v262_v2  ;;  %v2752_v2 = vld [vmem:[#allocation90_spill] sm:$0xff] }
 0x1dd   :  { %v711_v23 = vpop.permute.xlu0 %710  ;;  %v999_v18 = vsel %vm968_vm0, %v962_v15, 0.0  ;;  %v2741_v15 = vld [vmem:[#allocation84_spill] sm:$0xff]  ;;  %v805_v35 = vadd.f32 %v771_v22, %v677_v58  ;;  %v1055_v45 = vadd.s32 4294967288, %v2387_v50  ;;  %v1104_v58 = vadd.s32 4294967232, %v2387_v50 }
 0x1de   :  { %1000 = vadd.xlane.f32.xlu1 %v999_v18  ;;  %v326_v44 = vadd.f32 %v2741_v15, %v198_v43  ;;  %v868_v18 = vadd.f32 %v833_v61, %v740_v11  ;;  %v487_v21 = vadd.f32 %v2746_v7, %v391_v54  ;;  %v486_v48 = vadd.f32 %v2747_v57, %v390_v8  ;;  %v2750_v61 = vld [vmem:[#allocation128_spill] sm:$0xff] }
 0x1df   :  { %v1076_v7 = vadd.s32 4294967264, %v2387_v50  ;;  %v1083_v57 = vadd.s32 4294967256, %v2387_v50 }
 0x1e0   :  { %v895_v4 = vpop.permute.xlu1 %894  ;;  %v454_v6 = vadd.f32 %v2745_v32, %v326_v44  ;;  %v599_v0 = vadd.f32 %v2749_v20, %v487_v21  ;;  %v598_v5 = vadd.f32 %v2750_v61, %v486_v48  ;;  %v948_v40 = vmul.f32 %v868_v18, %v868_v18 }
 0x1e1   :  { %v835_v16 = vpop.permute.xlu0 %834  ;;  %v931_v60 = vadd.f32 %v895_v4, %v803_v36  ;;  %v519_v4 = vadd.f32 %v2752_v2, %v455_v30  ;;  %v1062_v30 = vadd.s32 4294967280, %v2387_v50  ;;  %v1069_v32 = vadd.s32 4294967272, %v2387_v50 }
 0x1e2   :  { %v869_v47 = vadd.f32 %v835_v16, %v741_v33  ;;  %v518_v19 = vadd.f32 %v2753_v34, %v454_v6  ;;  %v742_v38 = vadd.f32 %v2309_v28, %v598_v5  ;;  %v743_v12 = vadd.f32 %v711_v23, %v599_v0 }
 0x1e3   :  { %v963_v59 = vsub.f32 %v947_v51, %v931_v60  ;;  %v2754_v51 = vld [vmem:[#allocation137_spill] sm:$0xff]  ;;  %v1097_v5 = vadd.s32 4294967240, %v2387_v50 }
 0x1e4   :  { %v837_v46 = vpop.permute.xlu1 %836  ;;  %v679_v60 = vadd.f32 %v2754_v51, %v519_v4  ;;  %v678_v62 = vadd.f32 %v2755_v53, %v518_v19  ;;  %v949_v27 = vmul.f32 %v869_v47, %v869_v47  ;;  %v1118_v19 = vadd.s32 4294967216, %v2387_v50 }
 0x1e5   :  { %v773_v42 = vpop.permute.xlu0 %772  ;;  %v1002_v3 = vsel %vm968_vm0, %v963_v59, 0.0  ;;  %v870_v43 = vadd.f32 %v837_v46, %v742_v38  ;;  %v1125_v38 = vadd.s32 4294967208, %v2387_v50 }
 0x1e6   :  { %1003 = vadd.xlane.f32.xlu0 %v1002_v3  ;;  %v806_v9 = vadd.f32 %v773_v42, %v678_v62  ;;  %v2389_v3 = vshrl.u32 %v1049_v55, 7 }
 0x1e7   :  { %v950_v28 = vmul.f32 %v870_v43, %v870_v43  ;;  %v1132_v43 = vadd.s32 4294967200, %v2387_v50 }
 0x1e8   :  { %v775_v36 = vpop.permute.xlu1 %774  ;;  %v1053_v48 = vsub.s32 %v2387_v50, %v2389_v3  ;;  %v1058_v17 = vsub.s32 %v1055_v45, %v2389_v3  ;;  %v1065_v49 = vsub.s32 %v1062_v30, %v2389_v3  ;;  %v1072_v33 = vsub.s32 %v1069_v32, %v2389_v3 }
 0x1e9   :  { %v897_v37 = vpop.permute.xlu0 %896  ;;  %v807_v10 = vadd.f32 %v775_v36, %v679_v60  ;;  %v1079_v61 = vsub.s32 %v1076_v7, %v2389_v3  ;;  %v1086_v39 = vsub.s32 %v1083_v57, %v2389_v3  ;;  %v1107_v62 = vsub.s32 %v1104_v58, %v2389_v3 }
 0x1ea   :  { %v932_v52 = vadd.f32 %v897_v37, %v804_v13  ;;  %v1090_v13 = vadd.s32 4294967248, %v2387_v50 }
 0x1ec   :  { %v964_v31 = vsub.f32 %v948_v40, %v932_v52  ;;  %v899_v41 = vpop.permute.xlu1 %898  ;;  %v1111_v52 = vadd.s32 4294967224, %v2387_v50  ;;  %v1093_v4 = vsub.s32 %v1090_v13, %v2389_v3 }
 0x1ed   :  { %v839_v54 = vpop.permute.xlu0 %838  ;;  %v933_v8 = vadd.f32 %v899_v41, %v805_v35 }
 0x1ee   :  { %v871_v16 = vadd.f32 %v839_v54, %v743_v12  ;;  %v1005_v63 = vsel %vm968_vm0, %v964_v31, 0.0  ;;  %v1100_v31 = vsub.s32 %v1097_v5, %v2389_v3 }
 0x1ef   :  { %1006 = vadd.xlane.f32.xlu1 %v1005_v63  ;;  %v965_v24 = vsub.f32 %v949_v27, %v933_v8  ;;  %v1114_v8 = vsub.s32 %v1111_v52, %v2389_v3 }
 0x1f0   :  { %v903_v22 = vpop.permute.xlu1 %902  ;;  %v951_v26 = vmul.f32 %v871_v16, %v871_v16 }
 0x1f1   :  { %v901_v23 = vpop.permute.xlu0 %900  ;;  %v935_v29 = vadd.f32 %v903_v22, %v807_v10  ;;  %v1008_v59 = vsel %vm968_vm0, %v965_v24, 0.0  ;;  %v1128_v10 = vsub.s32 %v1125_v38, %v2389_v3 }
 0x1f2   :  { %v934_v11 = vadd.f32 %v901_v23, %v806_v9  ;;  %1009 = vadd.xlane.f32.xlu0 %v1008_v59  ;;  %v1121_v9 = vsub.s32 %v1118_v19, %v2389_v3 }
 0x1f3   :  { %v967_v25 = vsub.f32 %v951_v26, %v935_v29  ;;  %v1139_v29 = vadd.s32 4294967192, %v2387_v50 }
 0x1f4   :  { %v966_v14 = vsub.f32 %v950_v28, %v934_v11 }
 0x1f5   :  { %v1014_v15 = vsel %vm968_vm0, %v967_v25, 0.0  ;;  %v1142_v32 = vsub.s32 %v1139_v29, %v2389_v3 }
 0x1f6   :  { %v1011_v44 = vsel %vm968_vm0, %v966_v14, 0.0  ;;  %1015 = vadd.xlane.f32.xlu0 %v1014_v15  ;;  %v1135_v14 = vsub.s32 %v1132_v43, %v2389_v3 }
 0x1f7   :  { %1012 = vadd.xlane.f32.xlu1 %v1011_v44 }
 0x228   :  { %v971_v46 = vpop.xlane.xlu0 %970 }
 0x229   :  { %v1017_v40 = vmul.f32 0.5, %v971_v46 }
 0x22b   :  { %v974_v1 = vpop.xlane.xlu1 %973  ;;  %v1054_v41 = vrot.slane %v1017_v40, %v1053_v48 }
 0x22c   :  { %v1018_v0 = vmul.f32 0.5, %v974_v1 }
 0x22e   :  { %v1059_v35 = vrot.slane %v1018_v0, %v1058_v17 }
 0x230   :  { %v977_v42 = vpop.xlane.xlu0 %976  ;;  %v1061_v28 = vsel %vm1060_vm1, %v1059_v35, %v1054_v41 }
 0x231   :  { %v1019_v37 = vmul.f32 0.5, %v977_v42  ;;  %v1146_v42 = vadd.s32 4294967184, %v2387_v50 }
 0x233   :  { %v1066_v60 = vrot.slane %v1019_v37, %v1065_v49 }
 0x234   :  { %v980_v56 = vpop.xlane.xlu0 %979 }
 0x235   :  { %v1020_v47 = vmul.f32 0.5, %v980_v56  ;;  %v1068_v11 = vsel %vm1067_vm2, %v1066_v60, %v1061_v28 }
 0x237   :  { %v1073_v54 = vrot.slane %v1020_v47, %v1072_v33 }
 0x239   :  { %v1075_v15 = vsel %vm1074_vm3, %v1073_v54, %v1068_v11 }
 0x23c   :  { %v983_v18 = vpop.xlane.xlu1 %982 }
 0x23d   :  { %v1021_v2 = vmul.f32 0.5, %v983_v18  ;;  %v1153_v18 = vadd.s32 4294967176, %v2387_v50  ;;  %v1149_v50 = vsub.s32 %v1146_v42, %v2389_v3 }
 0x23f   :  { %v986_v6 = vpop.xlane.xlu0 %985  ;;  %v1080_v16 = vrot.slane %v1021_v2, %v1079_v61  ;;  %v1156_v13 = vsub.s32 %v1153_v18, %v2389_v3 }
 0x240   :  { %v1022_v12 = vmul.f32 0.5, %v986_v6 }
 0x241   :  { %v1082_v55 = vsel %vm1081_vm4, %v1080_v16, %v1075_v15 }
 0x242   :  { %v1087_v22 = vrot.slane %v1022_v12, %v1086_v39 }
 0x244   :  { %v1089_v45 = vsel %vm1088_vm5, %v1087_v22, %v1082_v55 }
 0x247   :  { %v989_v21 = vpop.xlane.xlu1 %988 }
 0x248   :  { %v1023_v53 = vmul.f32 0.5, %v989_v21 }
 0x24a   :  { %v1094_v59 = vrot.slane %v1023_v53, %v1093_v4 }
 0x24c   :  { %v1096_v7 = vsel %vm1095_vm6, %v1094_v59, %v1089_v45 }
 0x24f   :  { %v992_v20 = vpop.xlane.xlu0 %991 }
 0x250   :  { %v1024_v27 = vmul.f32 0.5, %v992_v20 }
 0x252   :  { %v1101_v44 = vrot.slane %v1024_v27, %v1100_v31 }
 0x254   :  { %v1103_v48 = vsel %vm1102_vm7, %v1101_v44, %v1096_v7 }
 0x257   :  { %v995_v36 = vpop.xlane.xlu1 %994 }
 0x258   :  { %v1025_v63 = vmul.f32 0.5, %v995_v36 }
 0x25a   :  { %v1108_v1 = vrot.slane %v1025_v63, %v1107_v62 }
 0x25c   :  { %v1110_v49 = vsel %vm1109_vm8, %v1108_v1, %v1103_v48 }
 0x25f   :  { %v998_v34 = vpop.xlane.xlu0 %997 }
 0x260   :  { %v1026_v23 = vmul.f32 0.5, %v998_v34 }
 0x262   :  { %v1115_v30 = vrot.slane %v1026_v23, %v1114_v8 }
 0x264   :  { %v1117_v20 = vsel %vm1116_vm9, %v1115_v30, %v1110_v49 }
 0x267   :  { %v1001_v51 = vpop.xlane.xlu1 %1000 }
 0x268   :  { %v1027_v25 = vmul.f32 0.5, %v1001_v51 }
 0x26a   :  { %v1122_v21 = vrot.slane %v1027_v25, %v1121_v9 }
 0x26c   :  { %v1124_v36 = vsel %vm1123_vm10, %v1122_v21, %v1117_v20 }
 0x26f   :  { %v1004_v24 = vpop.xlane.xlu0 %1003 }
 0x270   :  { %v1028_v46 = vmul.f32 0.5, %v1004_v24 }
 0x272   :  { %v1129_v17 = vrot.slane %v1028_v46, %v1128_v10 }
 0x274   :  { %v1131_v58 = vsel %vm1130_vm11, %v1129_v17, %v1124_v36 }
 0x278   :  { %v1007_v26 = vpop.xlane.xlu1 %1006 }
 0x279   :  { %v1029_v56 = vmul.f32 0.5, %v1007_v26 }
 0x27b   :  { %v1010_v6 = vpop.xlane.xlu0 %1009  ;;  %v1136_v33 = vrot.slane %v1029_v56, %v1135_v14 }
 0x27c   :  { %v1030_v57 = vmul.f32 0.5, %v1010_v6 }
 0x27d   :  { %v1138_v40 = vsel %vm1137_vm12, %v1136_v33, %v1131_v58 }
 0x27e   :  { %v1143_v0 = vrot.slane %v1030_v57, %v1142_v32 }
 0x27f   :  { %v1016_v5 = vpop.xlane.xlu0 %1015 }
 0x280   :  { %v1013_v61 = vpop.xlane.xlu1 %1012  ;;  %v1032_v39 = vmul.f32 0.5, %v1016_v5  ;;  %v1145_v2 = vsel %vm1144_vm13, %v1143_v0, %v1138_v40 }
 0x281   :  { %v1031_v37 = vmul.f32 0.5, %v1013_v61 }
 0x282   :  { %v1157_v52 = vrot.slane %v1032_v39, %v1156_v13 }
 0x283   :  { %v1150_v47 = vrot.slane %v1031_v37, %v1149_v50 }
 0x285   :  { %v1152_v4 = vsel %vm1151_vm14, %v1150_v47, %v1145_v2 }
 0x286   :  { %v1159_v34 = vsel %vm1158_vm15, %v1157_v52, %v1152_v4 }
 0x287   :  { %1161 = vst [vmem:[%s2434_s1] sm:$0x1] %v1159_v34 }

</bundles_post_ra>
